<compile_context>
chip_gen: v7x
topology: tpu7x:2x2x1
jax: 0.10.0
libtpu: 0.0.40
codegen_flags: <defaults>
</compile_context>

<pallas_src>
import math

import jax
import jax.numpy as jnp
from jax.experimental import pallas as pl
from jax.experimental.pallas import tpu as pltpu

# ----- model hyper-parameters (small, consistent with the module) -----
VOCAB = 100
HIDDEN = 32
N_LAYERS = 2
HEADS = 4
D_K = HIDDEN // HEADS
FF = HIDDEN * 4
EPS = 1e-6          # bert_pytorch LayerNorm eps
BATCH = 2
SEQ = 8
BS = BATCH * SEQ

# rows of the packed (6, HIDDEN) misc slab (biases / LayerNorm params)
_BO, _G1, _BE1, _G2, _BE2, _B2 = range(6)


# ---------------------------------------------------------------------------
# in-kernel helpers (all float32)
# ---------------------------------------------------------------------------
def _layernorm(x, g, b):
    # bert_pytorch LayerNorm: a_2 * (x - mean) / (std + eps) + b_2,
    # torch.std is unbiased (ddof = 1).
    mean = jnp.mean(x, axis=-1, keepdims=True)
    var = jnp.sum((x - mean) ** 2, axis=-1, keepdims=True) * (1.0 / (HIDDEN - 1))
    return g * (x - mean) / (jnp.sqrt(var) + EPS) + b


def _gelu(x):
    # bert_pytorch GELU (tanh approximation)
    return 0.5 * x * (1.0 + jnp.tanh(math.sqrt(2.0 / math.pi)
                                     * (x + 0.044715 * x ** 3)))


# ---------------------------------------------------------------------------
# fused transformer stack: one kernel, grid over layers, carry in o_ref
# ---------------------------------------------------------------------------
def bert_layers_kernel(keep_ref, x_ref,
                       wqkv_ref, wout_ref, wff1_ref, wff2_ref,
                       bqkv_ref, bff1_ref, misc_ref,
                       o_ref):
    l = pl.program_id(0)

    # layer 0: load the embedding activations into the resident output block
    # (same output block index for every layer -> acts as the VMEM carry).
    @pl.when(l == 0)
    def _():
        o_ref[...] = x_ref[...]

    x = o_ref[...]                               # (BS, H) f32 carried activation
    misc = misc_ref[...]                         # (6, H)  f32 biases / LN params
    b1 = bff1_ref[...]                           # (1, FF) f32

    # hoisted mask (head-independent): True where the key token is real
    keep_mat = jnp.broadcast_to(keep_ref[...][:, None, :],
                                (BATCH, SEQ, SEQ)) > 0.0

    # ---- attention sublayer:  x = x + Attn(LN(x)) ----
    xn = _layernorm(x, misc[_G1], misc[_BE1])
    xnb = xn.astype(jnp.bfloat16)
    # fused Q/K/V projection: one (BS, H) @ (H, 3H) matmul + one bias add
    qkv = jnp.dot(xnb, wqkv_ref[...],
                  preferred_element_type=jnp.float32) + bqkv_ref[...]

    scale = 1.0 / math.sqrt(D_K)
    attn = jnp.zeros((BS, HIDDEN), jnp.float32)
    for h in range(HEADS):                       # static unroll (HEADS = 4)
        qh = qkv[:, h * D_K:(h + 1) * D_K].reshape(BATCH, SEQ, D_K)
        kh = qkv[:, HIDDEN + h * D_K:HIDDEN + (h + 1) * D_K].reshape(BATCH, SEQ, D_K)
        vh = qkv[:, 2 * HIDDEN + h * D_K:2 * HIDDEN + (h + 1) * D_K].reshape(BATCH, SEQ, D_K)
        s = jnp.einsum('bqd,bkd->bqk', qh, kh,
                       preferred_element_type=jnp.float32) * scale
        s = jnp.where(keep_mat, s, -1e9)         # masked_fill, mask hoisted
        s = s - jnp.max(s, axis=-1, keepdims=True)
        p = jnp.exp(s)
        p = p / jnp.sum(p, axis=-1, keepdims=True)
        ctx = jnp.einsum('bqk,bkd->bqd', p, vh,
                         preferred_element_type=jnp.float32)
        # fold the head straight into the output projection (no lane concat)
        attn = attn + jnp.dot(ctx.reshape(BS, D_K).astype(jnp.bfloat16),
                              wout_ref[h],
                              preferred_element_type=jnp.float32)
    x = x + attn + misc[_BO]                     # dropout == identity (eval)

    # ---- feed-forward sublayer:  x = x + FFN(LN(x)) ----
    xn2 = _layernorm(x, misc[_G2], misc[_BE2])
    h1 = jnp.dot(xn2.astype(jnp.bfloat16), wff1_ref[...],
                 preferred_element_type=jnp.float32) + b1
    h1 = _gelu(h1)
    h2 = jnp.dot(h1.astype(jnp.bfloat16), wff2_ref[...],
                 preferred_element_type=jnp.float32) + misc[_B2]
    x = x + h2                                   # dropout == identity (eval)

    o_ref[...] = x                               # carry to the next layer / final out


def _nbytes(a):
    return int(a.size) * a.dtype.itemsize


def bert_layers(x_flat, keep, w_qkv, w_out, w_ff1, w_ff2, b_qkv, b_ff1, misc):
    """Run all N_LAYERS transformer blocks in a single pallas_call."""
    flops_per_layer = (
        2 * BS * HIDDEN * 3 * HIDDEN                         # fused q/k/v proj
        + HEADS * (4 * BATCH * SEQ * SEQ * D_K               # scores + ctx
                   + 2 * BS * D_K * HIDDEN)                  # per-head out proj
        + 2 * BS * HIDDEN * FF + 2 * BS * FF * HIDDEN)       # FFN
    transc_per_layer = BATCH * HEADS * SEQ * SEQ + BS * FF + 2 * BS
    param_bytes = (_nbytes(w_qkv) + _nbytes(w_out) + _nbytes(w_ff1)
                   + _nbytes(w_ff2) + _nbytes(b_qkv) + _nbytes(b_ff1)
                   + _nbytes(misc))
    cost = pl.CostEstimate(
        flops=N_LAYERS * flops_per_layer,
        transcendentals=N_LAYERS * transc_per_layer,
        bytes_accessed=param_bytes + 2 * _nbytes(x_flat) + _nbytes(keep))

    grid_spec = pltpu.PrefetchScalarGridSpec(
        num_scalar_prefetch=0,
        grid=(N_LAYERS,),
        in_specs=[
            pl.BlockSpec((BATCH, SEQ), lambda l: (0, 0)),            # keep mask
            pl.BlockSpec((BS, HIDDEN), lambda l: (0, 0)),            # embeddings
            pl.BlockSpec((None, HIDDEN, 3 * HIDDEN), lambda l: (l, 0, 0)),
            pl.BlockSpec((None, HEADS, D_K, HIDDEN), lambda l: (l, 0, 0, 0)),
            pl.BlockSpec((None, HIDDEN, FF), lambda l: (l, 0, 0)),
            pl.BlockSpec((None, FF, HIDDEN), lambda l: (l, 0, 0)),
            pl.BlockSpec((None, 1, 3 * HIDDEN), lambda l: (l, 0, 0)),
            pl.BlockSpec((None, 1, FF), lambda l: (l, 0, 0)),
            pl.BlockSpec((None, 6, HIDDEN), lambda l: (l, 0, 0)),
        ],
        out_specs=pl.BlockSpec((BS, HIDDEN), lambda l: (0, 0)),
    )
    return pl.pallas_call(
        bert_layers_kernel,
        out_shape=jax.ShapeDtypeStruct((BS, HIDDEN), jnp.float32),
        grid_spec=grid_spec,
        compiler_params=pltpu.CompilerParams(
            dimension_semantics=("arbitrary",)),       # layer axis is a carry
        cost_estimate=cost,
    )(keep, x_flat, w_qkv, w_out, w_ff1, w_ff2, b_qkv, b_ff1, misc)


# ---------------------------------------------------------------------------
# plain-JAX glue: embeddings + parameter init (packed into per-layer slabs)
# ---------------------------------------------------------------------------
def sinusoid_pe(max_len, d_model):
    position = jnp.arange(max_len, dtype=jnp.float32)[:, None]
    div_term = jnp.exp(jnp.arange(0, d_model, 2, dtype=jnp.float32)
                       * -(math.log(10000.0) / d_model))
    pe = jnp.zeros((max_len, d_model), jnp.float32)
    pe = pe.at[:, 0::2].set(jnp.sin(position * div_term))
    pe = pe.at[:, 1::2].set(jnp.cos(position * div_term))
    return pe


def init_block_params(key):
    ks = jax.random.split(key, 6)
    init = lambda k, shape: (0.02 * jax.random.normal(k, shape)).astype(jnp.float32)
    wq, wk, wv, wo = (init(ks[i], (HIDDEN, HIDDEN)) for i in range(4))
    w1 = init(ks[4], (HIDDEN, FF))
    w2 = init(ks[5], (FF, HIDDEN))
    w_qkv = jnp.concatenate([wq, wk, wv], axis=1).astype(jnp.bfloat16)   # (H, 3H)
    w_out = wo.reshape(HEADS, D_K, HIDDEN).astype(jnp.bfloat16)          # (HEADS, D_K, H)
    b_qkv = jnp.zeros((1, 3 * HIDDEN), jnp.float32)
    b_ff1 = jnp.zeros((1, FF), jnp.float32)
    misc = jnp.zeros((6, HIDDEN), jnp.float32)
    misc = misc.at[_G1].set(1.0).at[_G2].set(1.0)                        # LN gammas = 1
    return (w_qkv, w_out, w1.astype(jnp.bfloat16), w2.astype(jnp.bfloat16),
            b_qkv, b_ff1, misc)


def init_bert_params(key):
    k_tok, k_seg, k_blocks = jax.random.split(key, 3)
    tok_emb = (0.02 * jax.random.normal(k_tok, (VOCAB, HIDDEN))).astype(jnp.float32)
    tok_emb = tok_emb.at[0].set(0.0)          # padding_idx=0
    seg_emb = (0.02 * jax.random.normal(k_seg, (3, HIDDEN))).astype(jnp.float32)
    seg_emb = seg_emb.at[0].set(0.0)          # padding_idx=0
    pe = sinusoid_pe(512, HIDDEN)
    block_keys = jax.random.split(k_blocks, N_LAYERS)
    per_layer = [init_block_params(k) for k in block_keys]
    # stack each slab with a leading layer axis
    slabs = tuple(jnp.stack([blk[i] for blk in per_layer]) for i in range(7))
    return tok_emb, seg_emb, pe, slabs


@jax.jit
def bert_forward(tokens, segments, tok_emb, seg_emb, pe,
                 w_qkv, w_out, w_ff1, w_ff2, b_qkv, b_ff1, misc):
    Bn, Sn = tokens.shape
    # mask: key j is attendable iff tokens[b, j] > 0 (broadcast over queries/heads)
    keep = (tokens > 0).astype(jnp.float32)                      # (B, S)
    # BERTEmbedding: token + position + segment (dropout == identity in eval)
    # TODO(synk): embedding gather stays in plain JAX (no clean Pallas gather here).
    x = tok_emb[tokens] + pe[None, :Sn, :] + seg_emb[segments]   # (B, S, H)
    out = bert_layers(x.reshape(Bn * Sn, HIDDEN), keep,
                      w_qkv, w_out, w_ff1, w_ff2, b_qkv, b_ff1, misc)
    return out.reshape(Bn, Sn, HIDDEN)


# ---------------------------------------------------------------------------
if __name__ == "__main__":
    key = jax.random.PRNGKey(0)
    k_tok, k_seg, k_par = jax.random.split(key, 3)

    tokens = jax.random.randint(k_tok, (BATCH, SEQ), 0, VOCAB, dtype=jnp.int32)
    tokens = tokens.at[0, -2:].set(0)          # some padding to exercise the mask
    segments = jax.random.randint(k_seg, (BATCH, SEQ), 1, 3, dtype=jnp.int32)

    tok_emb, seg_emb, pe, slabs = init_bert_params(k_par)

    out = bert_forward(tokens, segments, tok_emb, seg_emb, pe, *slabs)
    out = jax.block_until_ready(out)
    assert out.shape == (BATCH, SEQ, HIDDEN) and out.dtype == jnp.float32
    assert bool(jnp.all(jnp.isfinite(out)))
    print("KERNEL_OK")
</pallas_src>

<mosaic_0001>
module attributes {stable_mosaic.version = 11 : i64} {
  func.func @bert_layers_kernel(%arg0: i32, %arg1: memref<2x8xf32, #tpu.memory_space<vmem>>, %arg2: memref<16x32xf32, #tpu.memory_space<vmem>>, %arg3: memref<1x32x96xbf16, #tpu.memory_space<vmem>>, %arg4: memref<1x4x8x32xbf16, #tpu.memory_space<vmem>>, %arg5: memref<1x32x128xbf16, #tpu.memory_space<vmem>>, %arg6: memref<1x128x32xbf16, #tpu.memory_space<vmem>>, %arg7: memref<1x1x96xf32, #tpu.memory_space<vmem>>, %arg8: memref<1x1x128xf32, #tpu.memory_space<vmem>>, %arg9: memref<1x6x32xf32, #tpu.memory_space<vmem>>, %arg10: memref<16x32xf32, #tpu.memory_space<vmem>>) attributes {dimension_semantics = [#tpu.dimension_semantics<arbitrary>], iteration_bounds = array<i64: 2>, scalar_prefetch = 0 : i64, scratch_operands = 0 : i64, tpu.core_type = #tpu.core_type<tc>, window_params = [{pipeline_mode = #tpu.pipeline_mode<synchronous>, transform_indices = @transform_0, window_bounds = array<i64: 2, 8>}, {pipeline_mode = #tpu.pipeline_mode<synchronous>, transform_indices = @transform_1, window_bounds = array<i64: 16, 32>}, {transform_indices = @transform_2, window_bounds = array<i64: 1, 32, 96>}, {transform_indices = @transform_3, window_bounds = array<i64: 1, 4, 8, 32>}, {transform_indices = @transform_4, window_bounds = array<i64: 1, 32, 128>}, {transform_indices = @transform_5, window_bounds = array<i64: 1, 128, 32>}, {transform_indices = @transform_6, window_bounds = array<i64: 1, 1, 96>}, {transform_indices = @transform_7, window_bounds = array<i64: 1, 1, 128>}, {transform_indices = @transform_8, window_bounds = array<i64: 1, 6, 32>}, {pipeline_mode = #tpu.pipeline_mode<synchronous>, transform_indices = @transform_9, window_bounds = array<i64: 16, 32>}]} {
    %c0_i32 = arith.constant 0 : i32
    %0 = arith.cmpi eq, %arg0, %c0_i32 : i32
    %1 = arith.extui %0 : i1 to i32
    %c0_i32_0 = arith.constant 0 : i32
    %2 = arith.cmpi ne, %1, %c0_i32_0 : i32
    scf.if %2 {
      %c0_83 = arith.constant 0 : index
      %c0_84 = arith.constant 0 : index
      %223 = vector.load %arg2[%c0_83, %c0_84] : memref<16x32xf32, #tpu.memory_space<vmem>>, vector<16x32xf32>
      %c0_85 = arith.constant 0 : index
      %c0_86 = arith.constant 0 : index
      %224 = vector.load %arg10[%c0_85, %c0_86] : memref<16x32xf32, #tpu.memory_space<vmem>>, vector<16x32xf32>
      tpu.vector_store %arg10[%c0_85, %c0_86], %223 {strides = array<i32>} : memref<16x32xf32, #tpu.memory_space<vmem>>, vector<16x32xf32>,
    } else {
    }
    %c0 = arith.constant 0 : index
    %c0_1 = arith.constant 0 : index
    %3 = vector.load %arg10[%c0, %c0_1] : memref<16x32xf32, #tpu.memory_space<vmem>>, vector<16x32xf32>
    %c0_2 = arith.constant 0 : index
    %c0_3 = arith.constant 0 : index
    %c0_4 = arith.constant 0 : index
    %4 = vector.load %arg9[%c0_2, %c0_3, %c0_4] : memref<1x6x32xf32, #tpu.memory_space<vmem>>, vector<1x6x32xf32>
    %5 = vector.shape_cast %4 : vector<1x6x32xf32> to vector<6x32xf32>
    %c0_5 = arith.constant 0 : index
    %c0_6 = arith.constant 0 : index
    %c0_7 = arith.constant 0 : index
    %6 = vector.load %arg8[%c0_5, %c0_6, %c0_7] : memref<1x1x128xf32, #tpu.memory_space<vmem>>, vector<1x1x128xf32>
    %7 = vector.shape_cast %6 : vector<1x1x128xf32> to vector<1x128xf32>
    %c0_8 = arith.constant 0 : index
    %c0_9 = arith.constant 0 : index
    %8 = vector.load %arg1[%c0_8, %c0_9] : memref<2x8xf32, #tpu.memory_space<vmem>>, vector<2x8xf32>
    %9 = vector.shape_cast %8 : vector<2x8xf32> to vector<2x1x8xf32>
    %10 = vector.shape_cast %9 : vector<2x1x8xf32> to vector<2x1x8xf32>
    %11 = vector.broadcast %10 : vector<2x1x8xf32> to vector<2x8x8xf32>
    %cst = arith.constant 0.000000e+00 : f32
    %12 = vector.broadcast %cst : f32 to vector<2x8x8xf32>
    %13 = arith.cmpf ogt, %11, %12 : vector<2x8x8xf32>
    %14 = vector.extract_strided_slice %5 {offsets = [1, 0], sizes = [1, 32], strides = [1, 1]} : vector<6x32xf32> to vector<1x32xf32>
    %15 = vector.shape_cast %14 : vector<1x32xf32> to vector<32xf32>
    %16 = vector.extract_strided_slice %5 {offsets = [2, 0], sizes = [1, 32], strides = [1, 1]} : vector<6x32xf32> to vector<1x32xf32>
    %17 = vector.shape_cast %16 : vector<1x32xf32> to vector<32xf32>
    %cst_10 = arith.constant dense<0.000000e+00> : vector<16xf32>
    %18 = vector.multi_reduction <add>, %3, %cst_10 [1] : vector<16x32xf32> to vector<16xf32>
    %19 = vector.shape_cast %18 : vector<16xf32> to vector<16x1xf32>
    %cst_11 = arith.constant 3.200000e+01 : f32
    %20 = vector.broadcast %cst_11 : f32 to vector<16x1xf32>
    %21 = arith.divf %19, %20 : vector<16x1xf32>
    %22 = vector.broadcast %21 : vector<16x1xf32> to vector<16x32xf32>
    %23 = arith.subf %3, %22 : vector<16x32xf32>
    %24 = arith.mulf %23, %23 : vector<16x32xf32>
    %cst_12 = arith.constant dense<0.000000e+00> : vector<16xf32>
    %25 = vector.multi_reduction <add>, %24, %cst_12 [1] : vector<16x32xf32> to vector<16xf32>
    %26 = vector.shape_cast %25 : vector<16xf32> to vector<16x1xf32>
    %cst_13 = arith.constant 0.0322580636 : f32
    %27 = vector.broadcast %cst_13 : f32 to vector<16x1xf32>
    %28 = arith.mulf %26, %27 : vector<16x1xf32>
    %29 = vector.broadcast %21 : vector<16x1xf32> to vector<16x32xf32>
    %30 = arith.subf %3, %29 : vector<16x32xf32>
    %31 = vector.shape_cast %15 : vector<32xf32> to vector<1x32xf32>
    %32 = vector.broadcast %31 : vector<1x32xf32> to vector<16x32xf32>
    %33 = arith.mulf %32, %30 : vector<16x32xf32>
    %34 = math.sqrt %28 : vector<16x1xf32>
    %cst_14 = arith.constant 9.99999997E-7 : f32
    %35 = vector.broadcast %cst_14 : f32 to vector<16x1xf32>
    %36 = arith.addf %34, %35 : vector<16x1xf32>
    %37 = vector.broadcast %36 : vector<16x1xf32> to vector<16x32xf32>
    %38 = arith.divf %33, %37 : vector<16x32xf32>
    %39 = vector.shape_cast %17 : vector<32xf32> to vector<1x32xf32>
    %40 = vector.broadcast %39 : vector<1x32xf32> to vector<16x32xf32>
    %41 = arith.addf %38, %40 : vector<16x32xf32>
    %42 = arith.truncf %41 : vector<16x32xf32> to vector<16x32xbf16>
    %c0_15 = arith.constant 0 : index
    %c0_16 = arith.constant 0 : index
    %c0_17 = arith.constant 0 : index
    %43 = vector.load %arg3[%c0_15, %c0_16, %c0_17] : memref<1x32x96xbf16, #tpu.memory_space<vmem>>, vector<1x32x96xbf16>
    %44 = vector.shape_cast %43 : vector<1x32x96xbf16> to vector<32x96xbf16>
    %cst_18 = arith.constant dense<0.000000e+00> : vector<16x96xf32>
    %45 = tpu.matmul %42, %44, %cst_18 {dimension_numbers = #tpu.dot_dimension_numbers<[1], [0], [0], [1], [0, 0, 1, 1], [], []>} : vector<16x32xbf16>, vector<32x96xbf16>, vector<16x96xf32> -> vector<16x96xf32>
    %c0_19 = arith.constant 0 : index
    %c0_20 = arith.constant 0 : index
    %c0_21 = arith.constant 0 : index
    %46 = vector.load %arg7[%c0_19, %c0_20, %c0_21] : memref<1x1x96xf32, #tpu.memory_space<vmem>>, vector<1x1x96xf32>
    %47 = vector.shape_cast %46 : vector<1x1x96xf32> to vector<1x96xf32>
    %48 = vector.broadcast %47 : vector<1x96xf32> to vector<16x96xf32>
    %49 = arith.addf %45, %48 : vector<16x96xf32>
    %cst_22 = arith.constant 0.000000e+00 : f32
    %50 = vector.broadcast %cst_22 : f32 to vector<16x32xf32>
    %51 = vector.extract_strided_slice %49 {offsets = [0, 0], sizes = [16, 8], strides = [1, 1]} : vector<16x96xf32> to vector<16x8xf32>
    %52 = vector.shape_cast %51 : vector<16x8xf32> to vector<2x8x8xf32>
    %53 = vector.extract_strided_slice %49 {offsets = [0, 32], sizes = [16, 8], strides = [1, 1]} : vector<16x96xf32> to vector<16x8xf32>
    %54 = vector.shape_cast %53 : vector<16x8xf32> to vector<2x8x8xf32>
    %55 = vector.extract_strided_slice %49 {offsets = [0, 64], sizes = [16, 8], strides = [1, 1]} : vector<16x96xf32> to vector<16x8xf32>
    %56 = vector.shape_cast %55 : vector<16x8xf32> to vector<2x8x8xf32>
    "tpu.trace_start"() <{level = 10 : i32, message = "bqd,bkd->bqk"}> : () -> ()
    %cst_23 = arith.constant dense<0.000000e+00> : vector<2x8x8xf32>
    %57 = tpu.matmul %52, %54, %cst_23 {dimension_numbers = #tpu.dot_dimension_numbers<[2], [2], [1], [1], [0, 0, 0, 1, 1, 1], [0], [0]>} : vector<2x8x8xf32>, vector<2x8x8xf32>, vector<2x8x8xf32> -> vector<2x8x8xf32>
    "tpu.trace_stop"() : () -> ()
    %cst_24 = arith.constant 0.353553385 : f32
    %58 = vector.broadcast %cst_24 : f32 to vector<2x8x8xf32>
    %59 = arith.mulf %57, %58 : vector<2x8x8xf32>
    %cst_25 = arith.constant -1.000000e+09 : f32
    %60 = vector.broadcast %cst_25 : f32 to vector<2x8x8xf32>
    %61 = arith.select %13, %59, %60 : vector<2x8x8xi1>, vector<2x8x8xf32>
    %cst_26 = arith.constant dense<0xFF800000> : vector<2x8xf32>
    %62 = vector.multi_reduction <maximumf>, %61, %cst_26 [2] : vector<2x8x8xf32> to vector<2x8xf32>
    %63 = vector.shape_cast %62 : vector<2x8xf32> to vector<2x8x1xf32>
    %64 = vector.broadcast %63 : vector<2x8x1xf32> to vector<2x8x8xf32>
    %65 = arith.subf %61, %64 : vector<2x8x8xf32>
    %66 = math.exp %65 : vector<2x8x8xf32>
    %cst_27 = arith.constant dense<0.000000e+00> : vector<2x8xf32>
    %67 = vector.multi_reduction <add>, %66, %cst_27 [2] : vector<2x8x8xf32> to vector<2x8xf32>
    %68 = vector.shape_cast %67 : vector<2x8xf32> to vector<2x8x1xf32>
    %69 = vector.broadcast %68 : vector<2x8x1xf32> to vector<2x8x8xf32>
    %70 = arith.divf %66, %69 : vector<2x8x8xf32>
    "tpu.trace_start"() <{level = 10 : i32, message = "bqk,bkd->bqd"}> : () -> ()
    %cst_28 = arith.constant dense<0.000000e+00> : vector<2x8x8xf32>
    %71 = tpu.matmul %70, %56, %cst_28 {dimension_numbers = #tpu.dot_dimension_numbers<[2], [1], [1], [2], [0, 0, 0, 1, 1, 2], [0], [0]>} : vector<2x8x8xf32>, vector<2x8x8xf32>, vector<2x8x8xf32> -> vector<2x8x8xf32>
    "tpu.trace_stop"() : () -> ()
    %72 = vector.shape_cast %71 : vector<2x8x8xf32> to vector<16x8xf32>
    %73 = arith.truncf %72 : vector<16x8xf32> to vector<16x8xbf16>
    %c0_29 = arith.constant 0 : index
    %c0_30 = arith.constant 0 : index
    %c0_31 = arith.constant 0 : index
    %c0_32 = arith.constant 0 : index
    %74 = vector.load %arg4[%c0_29, %c0_30, %c0_31, %c0_32] : memref<1x4x8x32xbf16, #tpu.memory_space<vmem>>, vector<1x1x8x32xbf16>
    %75 = vector.shape_cast %74 : vector<1x1x8x32xbf16> to vector<8x32xbf16>
    %cst_33 = arith.constant dense<0.000000e+00> : vector<16x32xf32>
    %76 = tpu.matmul %73, %75, %cst_33 {dimension_numbers = #tpu.dot_dimension_numbers<[1], [0], [0], [1], [0, 0, 1, 1], [], []>} : vector<16x8xbf16>, vector<8x32xbf16>, vector<16x32xf32> -> vector<16x32xf32>
    %77 = arith.addf %50, %76 : vector<16x32xf32>
    %78 = vector.extract_strided_slice %49 {offsets = [0, 8], sizes = [16, 8], strides = [1, 1]} : vector<16x96xf32> to vector<16x8xf32>
    %79 = vector.shape_cast %78 : vector<16x8xf32> to vector<2x8x8xf32>
    %80 = vector.extract_strided_slice %49 {offsets = [0, 40], sizes = [16, 8], strides = [1, 1]} : vector<16x96xf32> to vector<16x8xf32>
    %81 = vector.shape_cast %80 : vector<16x8xf32> to vector<2x8x8xf32>
    %82 = vector.extract_strided_slice %49 {offsets = [0, 72], sizes = [16, 8], strides = [1, 1]} : vector<16x96xf32> to vector<16x8xf32>
    %83 = vector.shape_cast %82 : vector<16x8xf32> to vector<2x8x8xf32>
    "tpu.trace_start"() <{level = 10 : i32, message = "bqd,bkd->bqk"}> : () -> ()
    %cst_34 = arith.constant dense<0.000000e+00> : vector<2x8x8xf32>
    %84 = tpu.matmul %79, %81, %cst_34 {dimension_numbers = #tpu.dot_dimension_numbers<[2], [2], [1], [1], [0, 0, 0, 1, 1, 1], [0], [0]>} : vector<2x8x8xf32>, vector<2x8x8xf32>, vector<2x8x8xf32> -> vector<2x8x8xf32>
    "tpu.trace_stop"() : () -> ()
    %cst_35 = arith.constant 0.353553385 : f32
    %85 = vector.broadcast %cst_35 : f32 to vector<2x8x8xf32>
    %86 = arith.mulf %84, %85 : vector<2x8x8xf32>
    %cst_36 = arith.constant -1.000000e+09 : f32
    %87 = vector.broadcast %cst_36 : f32 to vector<2x8x8xf32>
    %88 = arith.select %13, %86, %87 : vector<2x8x8xi1>, vector<2x8x8xf32>
    %cst_37 = arith.constant dense<0xFF800000> : vector<2x8xf32>
    %89 = vector.multi_reduction <maximumf>, %88, %cst_37 [2] : vector<2x8x8xf32> to vector<2x8xf32>
    %90 = vector.shape_cast %89 : vector<2x8xf32> to vector<2x8x1xf32>
    %91 = vector.broadcast %90 : vector<2x8x1xf32> to vector<2x8x8xf32>
    %92 = arith.subf %88, %91 : vector<2x8x8xf32>
    %93 = math.exp %92 : vector<2x8x8xf32>
    %cst_38 = arith.constant dense<0.000000e+00> : vector<2x8xf32>
    %94 = vector.multi_reduction <add>, %93, %cst_38 [2] : vector<2x8x8xf32> to vector<2x8xf32>
    %95 = vector.shape_cast %94 : vector<2x8xf32> to vector<2x8x1xf32>
    %96 = vector.broadcast %95 : vector<2x8x1xf32> to vector<2x8x8xf32>
    %97 = arith.divf %93, %96 : vector<2x8x8xf32>
    "tpu.trace_start"() <{level = 10 : i32, message = "bqk,bkd->bqd"}> : () -> ()
    %cst_39 = arith.constant dense<0.000000e+00> : vector<2x8x8xf32>
    %98 = tpu.matmul %97, %83, %cst_39 {dimension_numbers = #tpu.dot_dimension_numbers<[2], [1], [1], [2], [0, 0, 0, 1, 1, 2], [0], [0]>} : vector<2x8x8xf32>, vector<2x8x8xf32>, vector<2x8x8xf32> -> vector<2x8x8xf32>
    "tpu.trace_stop"() : () -> ()
    %99 = vector.shape_cast %98 : vector<2x8x8xf32> to vector<16x8xf32>
    %100 = arith.truncf %99 : vector<16x8xf32> to vector<16x8xbf16>
    %c0_40 = arith.constant 0 : index
    %c1 = arith.constant 1 : index
    %c0_41 = arith.constant 0 : index
    %c0_42 = arith.constant 0 : index
    %101 = vector.load %arg4[%c0_40, %c1, %c0_41, %c0_42] : memref<1x4x8x32xbf16, #tpu.memory_space<vmem>>, vector<1x1x8x32xbf16>
    %102 = vector.shape_cast %101 : vector<1x1x8x32xbf16> to vector<8x32xbf16>
    %cst_43 = arith.constant dense<0.000000e+00> : vector<16x32xf32>
    %103 = tpu.matmul %100, %102, %cst_43 {dimension_numbers = #tpu.dot_dimension_numbers<[1], [0], [0], [1], [0, 0, 1, 1], [], []>} : vector<16x8xbf16>, vector<8x32xbf16>, vector<16x32xf32> -> vector<16x32xf32>
    %104 = arith.addf %77, %103 : vector<16x32xf32>
    %105 = vector.extract_strided_slice %49 {offsets = [0, 16], sizes = [16, 8], strides = [1, 1]} : vector<16x96xf32> to vector<16x8xf32>
    %106 = vector.shape_cast %105 : vector<16x8xf32> to vector<2x8x8xf32>
    %107 = vector.extract_strided_slice %49 {offsets = [0, 48], sizes = [16, 8], strides = [1, 1]} : vector<16x96xf32> to vector<16x8xf32>
    %108 = vector.shape_cast %107 : vector<16x8xf32> to vector<2x8x8xf32>
    %109 = vector.extract_strided_slice %49 {offsets = [0, 80], sizes = [16, 8], strides = [1, 1]} : vector<16x96xf32> to vector<16x8xf32>
    %110 = vector.shape_cast %109 : vector<16x8xf32> to vector<2x8x8xf32>
    "tpu.trace_start"() <{level = 10 : i32, message = "bqd,bkd->bqk"}> : () -> ()
    %cst_44 = arith.constant dense<0.000000e+00> : vector<2x8x8xf32>
    %111 = tpu.matmul %106, %108, %cst_44 {dimension_numbers = #tpu.dot_dimension_numbers<[2], [2], [1], [1], [0, 0, 0, 1, 1, 1], [0], [0]>} : vector<2x8x8xf32>, vector<2x8x8xf32>, vector<2x8x8xf32> -> vector<2x8x8xf32>
    "tpu.trace_stop"() : () -> ()
    %cst_45 = arith.constant 0.353553385 : f32
    %112 = vector.broadcast %cst_45 : f32 to vector<2x8x8xf32>
    %113 = arith.mulf %111, %112 : vector<2x8x8xf32>
    %cst_46 = arith.constant -1.000000e+09 : f32
    %114 = vector.broadcast %cst_46 : f32 to vector<2x8x8xf32>
    %115 = arith.select %13, %113, %114 : vector<2x8x8xi1>, vector<2x8x8xf32>
    %cst_47 = arith.constant dense<0xFF800000> : vector<2x8xf32>
    %116 = vector.multi_reduction <maximumf>, %115, %cst_47 [2] : vector<2x8x8xf32> to vector<2x8xf32>
    %117 = vector.shape_cast %116 : vector<2x8xf32> to vector<2x8x1xf32>
    %118 = vector.broadcast %117 : vector<2x8x1xf32> to vector<2x8x8xf32>
    %119 = arith.subf %115, %118 : vector<2x8x8xf32>
    %120 = math.exp %119 : vector<2x8x8xf32>
    %cst_48 = arith.constant dense<0.000000e+00> : vector<2x8xf32>
    %121 = vector.multi_reduction <add>, %120, %cst_48 [2] : vector<2x8x8xf32> to vector<2x8xf32>
    %122 = vector.shape_cast %121 : vector<2x8xf32> to vector<2x8x1xf32>
    %123 = vector.broadcast %122 : vector<2x8x1xf32> to vector<2x8x8xf32>
    %124 = arith.divf %120, %123 : vector<2x8x8xf32>
    "tpu.trace_start"() <{level = 10 : i32, message = "bqk,bkd->bqd"}> : () -> ()
    %cst_49 = arith.constant dense<0.000000e+00> : vector<2x8x8xf32>
    %125 = tpu.matmul %124, %110, %cst_49 {dimension_numbers = #tpu.dot_dimension_numbers<[2], [1], [1], [2], [0, 0, 0, 1, 1, 2], [0], [0]>} : vector<2x8x8xf32>, vector<2x8x8xf32>, vector<2x8x8xf32> -> vector<2x8x8xf32>
    "tpu.trace_stop"() : () -> ()
    %126 = vector.shape_cast %125 : vector<2x8x8xf32> to vector<16x8xf32>
    %127 = arith.truncf %126 : vector<16x8xf32> to vector<16x8xbf16>
    %c0_50 = arith.constant 0 : index
    %c2 = arith.constant 2 : index
    %c0_51 = arith.constant 0 : index
    %c0_52 = arith.constant 0 : index
    %128 = vector.load %arg4[%c0_50, %c2, %c0_51, %c0_52] : memref<1x4x8x32xbf16, #tpu.memory_space<vmem>>, vector<1x1x8x32xbf16>
    %129 = vector.shape_cast %128 : vector<1x1x8x32xbf16> to vector<8x32xbf16>
    %cst_53 = arith.constant dense<0.000000e+00> : vector<16x32xf32>
    %130 = tpu.matmul %127, %129, %cst_53 {dimension_numbers = #tpu.dot_dimension_numbers<[1], [0], [0], [1], [0, 0, 1, 1], [], []>} : vector<16x8xbf16>, vector<8x32xbf16>, vector<16x32xf32> -> vector<16x32xf32>
    %131 = arith.addf %104, %130 : vector<16x32xf32>
    %132 = vector.extract_strided_slice %49 {offsets = [0, 24], sizes = [16, 8], strides = [1, 1]} : vector<16x96xf32> to vector<16x8xf32>
    %133 = vector.shape_cast %132 : vector<16x8xf32> to vector<2x8x8xf32>
    %134 = vector.extract_strided_slice %49 {offsets = [0, 56], sizes = [16, 8], strides = [1, 1]} : vector<16x96xf32> to vector<16x8xf32>
    %135 = vector.shape_cast %134 : vector<16x8xf32> to vector<2x8x8xf32>
    %136 = vector.extract_strided_slice %49 {offsets = [0, 88], sizes = [16, 8], strides = [1, 1]} : vector<16x96xf32> to vector<16x8xf32>
    %137 = vector.shape_cast %136 : vector<16x8xf32> to vector<2x8x8xf32>
    "tpu.trace_start"() <{level = 10 : i32, message = "bqd,bkd->bqk"}> : () -> ()
    %cst_54 = arith.constant dense<0.000000e+00> : vector<2x8x8xf32>
    %138 = tpu.matmul %133, %135, %cst_54 {dimension_numbers = #tpu.dot_dimension_numbers<[2], [2], [1], [1], [0, 0, 0, 1, 1, 1], [0], [0]>} : vector<2x8x8xf32>, vector<2x8x8xf32>, vector<2x8x8xf32> -> vector<2x8x8xf32>
    "tpu.trace_stop"() : () -> ()
    %cst_55 = arith.constant 0.353553385 : f32
    %139 = vector.broadcast %cst_55 : f32 to vector<2x8x8xf32>
    %140 = arith.mulf %138, %139 : vector<2x8x8xf32>
    %cst_56 = arith.constant -1.000000e+09 : f32
    %141 = vector.broadcast %cst_56 : f32 to vector<2x8x8xf32>
    %142 = arith.select %13, %140, %141 : vector<2x8x8xi1>, vector<2x8x8xf32>
    %cst_57 = arith.constant dense<0xFF800000> : vector<2x8xf32>
    %143 = vector.multi_reduction <maximumf>, %142, %cst_57 [2] : vector<2x8x8xf32> to vector<2x8xf32>
    %144 = vector.shape_cast %143 : vector<2x8xf32> to vector<2x8x1xf32>
    %145 = vector.broadcast %144 : vector<2x8x1xf32> to vector<2x8x8xf32>
    %146 = arith.subf %142, %145 : vector<2x8x8xf32>
    %147 = math.exp %146 : vector<2x8x8xf32>
    %cst_58 = arith.constant dense<0.000000e+00> : vector<2x8xf32>
    %148 = vector.multi_reduction <add>, %147, %cst_58 [2] : vector<2x8x8xf32> to vector<2x8xf32>
    %149 = vector.shape_cast %148 : vector<2x8xf32> to vector<2x8x1xf32>
    %150 = vector.broadcast %149 : vector<2x8x1xf32> to vector<2x8x8xf32>
    %151 = arith.divf %147, %150 : vector<2x8x8xf32>
    "tpu.trace_start"() <{level = 10 : i32, message = "bqk,bkd->bqd"}> : () -> ()
    %cst_59 = arith.constant dense<0.000000e+00> : vector<2x8x8xf32>
    %152 = tpu.matmul %151, %137, %cst_59 {dimension_numbers = #tpu.dot_dimension_numbers<[2], [1], [1], [2], [0, 0, 0, 1, 1, 2], [0], [0]>} : vector<2x8x8xf32>, vector<2x8x8xf32>, vector<2x8x8xf32> -> vector<2x8x8xf32>
    "tpu.trace_stop"() : () -> ()
    %153 = vector.shape_cast %152 : vector<2x8x8xf32> to vector<16x8xf32>
    %154 = arith.truncf %153 : vector<16x8xf32> to vector<16x8xbf16>
    %c0_60 = arith.constant 0 : index
    %c3 = arith.constant 3 : index
    %c0_61 = arith.constant 0 : index
    %c0_62 = arith.constant 0 : index
    %155 = vector.load %arg4[%c0_60, %c3, %c0_61, %c0_62] : memref<1x4x8x32xbf16, #tpu.memory_space<vmem>>, vector<1x1x8x32xbf16>
    %156 = vector.shape_cast %155 : vector<1x1x8x32xbf16> to vector<8x32xbf16>
    %cst_63 = arith.constant dense<0.000000e+00> : vector<16x32xf32>
    %157 = tpu.matmul %154, %156, %cst_63 {dimension_numbers = #tpu.dot_dimension_numbers<[1], [0], [0], [1], [0, 0, 1, 1], [], []>} : vector<16x8xbf16>, vector<8x32xbf16>, vector<16x32xf32> -> vector<16x32xf32>
    %158 = arith.addf %131, %157 : vector<16x32xf32>
    %159 = arith.addf %3, %158 : vector<16x32xf32>
    %160 = vector.extract_strided_slice %5 {offsets = [0, 0], sizes = [1, 32], strides = [1, 1]} : vector<6x32xf32> to vector<1x32xf32>
    %161 = vector.shape_cast %160 : vector<1x32xf32> to vector<32xf32>
    %162 = vector.shape_cast %161 : vector<32xf32> to vector<1x32xf32>
    %163 = vector.broadcast %162 : vector<1x32xf32> to vector<16x32xf32>
    %164 = arith.addf %159, %163 : vector<16x32xf32>
    %165 = vector.extract_strided_slice %5 {offsets = [3, 0], sizes = [1, 32], strides = [1, 1]} : vector<6x32xf32> to vector<1x32xf32>
    %166 = vector.shape_cast %165 : vector<1x32xf32> to vector<32xf32>
    %167 = vector.extract_strided_slice %5 {offsets = [4, 0], sizes = [1, 32], strides = [1, 1]} : vector<6x32xf32> to vector<1x32xf32>
    %168 = vector.shape_cast %167 : vector<1x32xf32> to vector<32xf32>
    %cst_64 = arith.constant dense<0.000000e+00> : vector<16xf32>
    %169 = vector.multi_reduction <add>, %164, %cst_64 [1] : vector<16x32xf32> to vector<16xf32>
    %170 = vector.shape_cast %169 : vector<16xf32> to vector<16x1xf32>
    %cst_65 = arith.constant 3.200000e+01 : f32
    %171 = vector.broadcast %cst_65 : f32 to vector<16x1xf32>
    %172 = arith.divf %170, %171 : vector<16x1xf32>
    %173 = vector.broadcast %172 : vector<16x1xf32> to vector<16x32xf32>
    %174 = arith.subf %164, %173 : vector<16x32xf32>
    %175 = arith.mulf %174, %174 : vector<16x32xf32>
    %cst_66 = arith.constant dense<0.000000e+00> : vector<16xf32>
    %176 = vector.multi_reduction <add>, %175, %cst_66 [1] : vector<16x32xf32> to vector<16xf32>
    %177 = vector.shape_cast %176 : vector<16xf32> to vector<16x1xf32>
    %cst_67 = arith.constant 0.0322580636 : f32
    %178 = vector.broadcast %cst_67 : f32 to vector<16x1xf32>
    %179 = arith.mulf %177, %178 : vector<16x1xf32>
    %180 = vector.broadcast %172 : vector<16x1xf32> to vector<16x32xf32>
    %181 = arith.subf %164, %180 : vector<16x32xf32>
    %182 = vector.shape_cast %166 : vector<32xf32> to vector<1x32xf32>
    %183 = vector.broadcast %182 : vector<1x32xf32> to vector<16x32xf32>
    %184 = arith.mulf %183, %181 : vector<16x32xf32>
    %185 = math.sqrt %179 : vector<16x1xf32>
    %cst_68 = arith.constant 9.99999997E-7 : f32
    %186 = vector.broadcast %cst_68 : f32 to vector<16x1xf32>
    %187 = arith.addf %185, %186 : vector<16x1xf32>
    %188 = vector.broadcast %187 : vector<16x1xf32> to vector<16x32xf32>
    %189 = arith.divf %184, %188 : vector<16x32xf32>
    %190 = vector.shape_cast %168 : vector<32xf32> to vector<1x32xf32>
    %191 = vector.broadcast %190 : vector<1x32xf32> to vector<16x32xf32>
    %192 = arith.addf %189, %191 : vector<16x32xf32>
    %193 = arith.truncf %192 : vector<16x32xf32> to vector<16x32xbf16>
    %c0_69 = arith.constant 0 : index
    %c0_70 = arith.constant 0 : index
    %c0_71 = arith.constant 0 : index
    %194 = vector.load %arg5[%c0_69, %c0_70, %c0_71] : memref<1x32x128xbf16, #tpu.memory_space<vmem>>, vector<1x32x128xbf16>
    %195 = vector.shape_cast %194 : vector<1x32x128xbf16> to vector<32x128xbf16>
    %cst_72 = arith.constant dense<0.000000e+00> : vector<16x128xf32>
    %196 = tpu.matmul %193, %195, %cst_72 {dimension_numbers = #tpu.dot_dimension_numbers<[1], [0], [0], [1], [0, 0, 1, 1], [], []>} : vector<16x32xbf16>, vector<32x128xbf16>, vector<16x128xf32> -> vector<16x128xf32>
    %197 = vector.broadcast %7 : vector<1x128xf32> to vector<16x128xf32>
    %198 = arith.addf %196, %197 : vector<16x128xf32>
    %cst_73 = arith.constant 5.000000e-01 : f32
    %199 = vector.broadcast %cst_73 : f32 to vector<16x128xf32>
    %200 = arith.mulf %199, %198 : vector<16x128xf32>
    %201 = arith.mulf %198, %198 : vector<16x128xf32>
    %202 = arith.mulf %198, %201 : vector<16x128xf32>
    %cst_74 = arith.constant 4.471500e-02 : f32
    %203 = vector.broadcast %cst_74 : f32 to vector<16x128xf32>
    %204 = arith.mulf %203, %202 : vector<16x128xf32>
    %205 = arith.addf %198, %204 : vector<16x128xf32>
    %cst_75 = arith.constant 0.797884583 : f32
    %206 = vector.broadcast %cst_75 : f32 to vector<16x128xf32>
    %207 = arith.mulf %206, %205 : vector<16x128xf32>
    %208 = math.tanh %207 : vector<16x128xf32>
    %cst_76 = arith.constant 1.000000e+00 : f32
    %209 = vector.broadcast %cst_76 : f32 to vector<16x128xf32>
    %210 = arith.addf %209, %208 : vector<16x128xf32>
    %211 = arith.mulf %200, %210 : vector<16x128xf32>
    %212 = arith.truncf %211 : vector<16x128xf32> to vector<16x128xbf16>
    %c0_77 = arith.constant 0 : index
    %c0_78 = arith.constant 0 : index
    %c0_79 = arith.constant 0 : index
    %213 = vector.load %arg6[%c0_77, %c0_78, %c0_79] : memref<1x128x32xbf16, #tpu.memory_space<vmem>>, vector<1x128x32xbf16>
    %214 = vector.shape_cast %213 : vector<1x128x32xbf16> to vector<128x32xbf16>
    %cst_80 = arith.constant dense<0.000000e+00> : vector<16x32xf32>
    %215 = tpu.matmul %212, %214, %cst_80 {dimension_numbers = #tpu.dot_dimension_numbers<[1], [0], [0], [1], [0, 0, 1, 1], [], []>} : vector<16x128xbf16>, vector<128x32xbf16>, vector<16x32xf32> -> vector<16x32xf32>
    %216 = vector.extract_strided_slice %5 {offsets = [5, 0], sizes = [1, 32], strides = [1, 1]} : vector<6x32xf32> to vector<1x32xf32>
    %217 = vector.shape_cast %216 : vector<1x32xf32> to vector<32xf32>
    %218 = vector.shape_cast %217 : vector<32xf32> to vector<1x32xf32>
    %219 = vector.broadcast %218 : vector<1x32xf32> to vector<16x32xf32>
    %220 = arith.addf %215, %219 : vector<16x32xf32>
    %221 = arith.addf %164, %220 : vector<16x32xf32>
    %c0_81 = arith.constant 0 : index
    %c0_82 = arith.constant 0 : index
    %222 = vector.load %arg10[%c0_81, %c0_82] : memref<16x32xf32, #tpu.memory_space<vmem>>, vector<16x32xf32>
    tpu.vector_store %arg10[%c0_81, %c0_82], %221 {strides = array<i32>} : memref<16x32xf32, #tpu.memory_space<vmem>>, vector<16x32xf32>,
    return
  }
  func.func @transform_0(%arg0: i32) -> (i32, i32) {
    %c0_i32 = arith.constant 0 : i32
    %c0_i32_0 = arith.constant 0 : i32
    %c0_i32_1 = arith.constant 0 : i32
    return %c0_i32, %c0_i32_0 : i32, i32
  }
  func.func @transform_1(%arg0: i32) -> (i32, i32) {
    %c0_i32 = arith.constant 0 : i32
    %c0_i32_0 = arith.constant 0 : i32
    %c0_i32_1 = arith.constant 0 : i32
    return %c0_i32, %c0_i32_0 : i32, i32
  }
  func.func @transform_2(%arg0: i32) -> (i32, i32, i32) {
    %c0_i32 = arith.constant 0 : i32
    %c0_i32_0 = arith.constant 0 : i32
    %c0_i32_1 = arith.constant 0 : i32
    return %arg0, %c0_i32, %c0_i32_0 : i32, i32, i32
  }
  func.func @transform_3(%arg0: i32) -> (i32, i32, i32, i32) {
    %c0_i32 = arith.constant 0 : i32
    %c0_i32_0 = arith.constant 0 : i32
    %c0_i32_1 = arith.constant 0 : i32
    %c0_i32_2 = arith.constant 0 : i32
    return %arg0, %c0_i32, %c0_i32_0, %c0_i32_1 : i32, i32, i32, i32
  }
  func.func @transform_4(%arg0: i32) -> (i32, i32, i32) {
    %c0_i32 = arith.constant 0 : i32
    %c0_i32_0 = arith.constant 0 : i32
    %c0_i32_1 = arith.constant 0 : i32
    return %arg0, %c0_i32, %c0_i32_0 : i32, i32, i32
  }
  func.func @transform_5(%arg0: i32) -> (i32, i32, i32) {
    %c0_i32 = arith.constant 0 : i32
    %c0_i32_0 = arith.constant 0 : i32
    %c0_i32_1 = arith.constant 0 : i32
    return %arg0, %c0_i32, %c0_i32_0 : i32, i32, i32
  }
  func.func @transform_6(%arg0: i32) -> (i32, i32, i32) {
    %c0_i32 = arith.constant 0 : i32
    %c0_i32_0 = arith.constant 0 : i32
    %c0_i32_1 = arith.constant 0 : i32
    return %arg0, %c0_i32, %c0_i32_0 : i32, i32, i32
  }
  func.func @transform_7(%arg0: i32) -> (i32, i32, i32) {
    %c0_i32 = arith.constant 0 : i32
    %c0_i32_0 = arith.constant 0 : i32
    %c0_i32_1 = arith.constant 0 : i32
    return %arg0, %c0_i32, %c0_i32_0 : i32, i32, i32
  }
  func.func @transform_8(%arg0: i32) -> (i32, i32, i32) {
    %c0_i32 = arith.constant 0 : i32
    %c0_i32_0 = arith.constant 0 : i32
    %c0_i32_1 = arith.constant 0 : i32
    return %arg0, %c0_i32, %c0_i32_0 : i32, i32, i32
  }
  func.func @transform_9(%arg0: i32) -> (i32, i32) {
    %c0_i32 = arith.constant 0 : i32
    %c0_i32_0 = arith.constant 0 : i32
    %c0_i32_1 = arith.constant 0 : i32
    return %c0_i32, %c0_i32_0 : i32, i32
  }
}

</mosaic_0001>

<bundles_post_ra>
// kernel: bert_forward.1
= control target key start
LH: loop header
LB: loop body
LE: loop exit
PB: predicated region body
PF: predicated region fallthrough
CT: control target
= control target key end

     0   :  { %s3338_s0 = inlined_call_operand.vmem [shape: f32[2,8], index: 0, kind: input, shape index: {}]   ;;  %s3339_s1 = inlined_call_operand.vmem [shape: f32[16,32], index: 1, kind: input, shape index: {}]   ;;  %s3340_s2 = inlined_call_operand.vmem [shape: bf16[2,32,96], index: 2, kind: input, shape index: {}]   ;;  %s3341_s3 = inlined_call_operand.vmem [shape: bf16[2,4,8,32], index: 3, kind: input, shape index: {}]   ;;  %s3342_s4 = inlined_call_operand.vmem [shape: bf16[2,32,128], index: 4, kind: input, shape index: {}]   ;;  %s3343_s5 = inlined_call_operand.vmem [shape: bf16[2,128,32], index: 5, kind: input, shape index: {}]   ;;  %s3344_s6 = inlined_call_operand.vmem [shape: f32[2,1,96], index: 6, kind: input, shape index: {}]   ;;  %s3345_s7 = inlined_call_operand.vmem [shape: f32[2,1,128], index: 7, kind: input, shape index: {}]   ;;  %s3346_s8 = inlined_call_operand.vmem [shape: f32[2,6,32], index: 8, kind: input, shape index: {}]   ;;  %s3347_s9 = inlined_call_operand.hbm [shape: f32[16,32], index: 9, kind: output, shape index: {}]  }
   0x1   :  { %3348 = sst [smem:[#allocation5_spill]] %s3340_s2 }
   0x2   :  { %14 = vsyncpa [#allocation3], 0  ;;  %s2973_s30 = smov 0  }
   0x3 LB: > { %s2979_s10 = sadd.s32 4294967295, %s2904_s30   ;;  %p2511_p0 = scmp.ge.s32.totalorder %s2904_s30, 1  ;;  %s2904_s30 = sphi %s2973_s30, %s20_s30  }
   0x4   : > { %p338_p1 = scmp.lt.s32.totalorder %s2904_s30, 3 }
   0x6   : > { %p339_p2 = pnand %p2511_p0, %p338_p1 }
   0x7   : > { %p394_p3 = scmp.lt.s32.totalorder (!%p339_p2), %s2979_s10, 1  ;;  %s3349_s2 = sld [smem:[#allocation5_spill]] (!%p339_p2) }
   0x8   : > { %342 = sbr.rel (%p339_p2) target bundleno = 4292 (0x10c4), region = 56  ;;  %p2521_p4 = scmp.ne.s32.totalorder (!%p339_p2), %s2979_s10, 0 }
   0xf   : > { %s2985_s11 = scalar_select %p394_p3, %s2979_s10, 1 }
  0x10   : > { %428 = sbr.rel (%p2521_p4) target bundleno = 23 (0x17), region = 60  ;;  %v429_v0 = vld [vmem:[%s3339_s1] sm:$0xff] (!%p2521_p4)  ;;  %vm431_vm0 = vcmask (!%p2521_p4), 261120   ;;  %v430_v1 = vld [vmem:[%s3339_s1 + $0x8] sm:$0xff] (!%p2521_p4) }
  0x11   : > { %s2574_s12 = sshll.u32 %s2985_s11, 4  ;;  %s2577_s13 = sshll.u32 %s2985_s11, 6  ;;  %432 = vst.msk [vmem:[#allocation2] sm:$0xff] (!%p2521_p4), %vm431_vm0, %v429_v0  ;;  %433 = vst.msk [vmem:[#allocation2 + $0x8] sm:$0xff] (!%p2521_p4), %vm431_vm0, %v430_v1 }
  0x12   : > { %s2992_s16 = scalar_lea.vmem %s3349_s2, %s2574_s12  ;;  %s2997_s19 = scalar_lea.vmem %s3341_s3, %s2574_s12 }
  0x13   : > { %s3002_s22 = scalar_lea.vmem %s3342_s4, %s2574_s12  ;;  %s3007_s25 = scalar_lea.vmem %s3343_s5, %s2577_s13 }
  0x14   : > { %s416_s28 = scalar_lea.vmem %s3344_s6, %s2985_s11  ;;  %s419_s15 = scalar_lea.vmem %s3345_s7, %s2985_s11 }
  0x15   : > { %s2520_s17 = sshll.u32 %s2985_s11, 3 }
  0x16   : > { %s3021_s20 = scalar_lea.vmem %s3346_s8, %s2520_s17 }
  0x17 PF: > { %vm474_vm1 = vcmask 261120   ;;  %v2804_v16 = vld [vmem:[%s2992_s16] sm:$0xff]   ;;  %v2906_v17 = vmov 0.0   ;;  %vm2907_vm2 = vmmov 0   ;;  %v2805_v18 = vld [vmem:[%s2992_s16 + $0x8] sm:$0xff]   ;;  %v451_v25 = vlaneseq  ;;  %s2908_s24 = smov 96  }
  0x18   : > { %v3030_v2 = vld [vmem:[#allocation2] sm:$0xff]  ;;  %v3032_v3 = vld [vmem:[#allocation2 + $0x8] sm:$0xff]  ;;  %2633 = vmatprep.subr.bf16.mxu0 %v2906_v17  ;;  %2637 = vmatprep.mubr.msk.bf16.mxu0 %vm2907_vm2, %v2906_v17  ;;  %vm599_vm7 = vcmask 64512   ;;  %v2909_v60 = vmov 1966171168   ;;  %s2911_s29 = smov 88  }
  0x19   : > { %v475_v4 = vsel %vm474_vm1, %v3030_v2, 0.0  ;;  %v478_v5 = vsel %vm474_vm1, %v3032_v3, 0.0  ;;  %2634 = vmatpush3.bf16.msra.mxu0 %v2804_v16  ;;  %2646 = vmatprep.subr.mxu1 %v2906_v17  ;;  %v3052_v32 = vshrl.u32 %v451_v25, 7  ;;  %v3056_v38 = vld [vmem:[%s3021_s20] sm:$0x3f]  ;;  %v449_v61 = vunpack.c.l.s4 %v2909_v60  ;;  %s2912_s14 = smov 120  }
  0x1a   : > { %476 = vadd.xlane.f32.xlu0 %v475_v4  ;;  %2635 = vmatprep.subr.bf16.mxu0 %v2906_v17  ;;  %v2523_v51 = vld [vmem:[%s416_s28] ss:$0 sm:$0xff]  ;;  %s2910_s28 = smov 64   ;;  %s2913_s17 = smov 56   ;;  %vm1271_vm10 = vcmask 1043456  }
  0x1b   : > { %2648 = vmatprep.mubr.msk.f32.mxu1 %vm2907_vm2, %v2906_v17  ;;  %v498_v37 = vsub.s32 1, %v3052_v32  ;;  %v524_v40 = vsub.s32 2, %v3052_v32  ;;  %v450_v62 = vunpack.c.0.s8 %v449_v61  ;;  %v2522_v63 = vld.sshfl [vmem:[%s3338_s0] sm:$0x11 pattern:$0x75316420] }
  0x1c   : > { %v447_v1 = vcombine.high %v2522_v63, %v2522_v63  ;;  %s2914_s18 = smov 80   ;;  %s2915_s20 = smov 112  }
  0x1d   : > { %2636 = vmatpush3.bf16.msra.mxu0 %v2805_v18  ;;  %v499_v39 = vrot.slane %v3056_v38, %v498_v37  ;;  %v525_v45 = vrot.slane %v3056_v38, %v524_v40  ;;  %v453_v0 = vsub.s32 %v450_v62, %v3052_v32  ;;  %s2916_s12 = smov 72   ;;  %s2917_s13 = smov 48  }
  0x1e   : > { %479 = vadd.xlane.f32.xlu0 %v478_v5  ;;  %2641 = vmatprep.subr.mxu0 %v2906_v17  ;;  %v3092_v5 = vsub.s32 0, %v3052_v32  ;;  %s2918_s21 = smov 104   ;;  %s2919_s23 = smov 40  }
  0x1f   : > { %v454_v4 = vrot.slane %v2522_v63, %v453_v0  ;;  %s2920_s11 = smov [#allocation2]   ;;  %p2777_p5 = scmp.eq.s32.totalorder %s2979_s10, 1 }
  0xa7   : > { %v477_v6 = vpop.xlane.xlu0 %476 }
  0xa8   : > { %v482_v7 = vmul.f32 0.03125, %v477_v6  ;;  %v461_v6 = vrot.slane %v447_v1, %v453_v0 }
  0xaa   : > { %v484_v8 = vsub.f32 %v3030_v2, %v482_v7  ;;  %v3095_v7 = vrot.slane %v454_v4, %v3092_v5 }
  0xab   : > { %v480_v9 = vpop.xlane.xlu0 %479 }
  0xac   : > { %v483_v10 = vmul.f32 0.03125, %v480_v9  ;;  %v486_v11 = vmul.f32 %v484_v8, %v484_v8  ;;  %v500_v42 = vmul.f32 %v499_v39, %v484_v8  ;;  %v469_v8 = vrot.slane %v461_v6, %v3092_v5 }
  0xad   : > { %vm472_vm8 = vcmp.gt.f32.partialorder %v3095_v7, 0.0 }
  0xae   : > { %v485_v12 = vsub.f32 %v3032_v3, %v483_v10  ;;  %v488_v13 = vsel %vm474_vm1, %v486_v11, 0.0  ;;  %vm3099_vm9 = vcmp.gt.f32.partialorder %v469_v8, 0.0 }
  0xaf   : > { %489 = vadd.xlane.f32.xlu1 %v488_v13 }
  0xb0   : > { %v487_v14 = vmul.f32 %v485_v12, %v485_v12  ;;  %v501_v43 = vmul.f32 %v499_v39, %v485_v12 }
  0xb2   : > { %v491_v15 = vsel %vm474_vm1, %v487_v14, 0.0 }
  0xb3   : > { %492 = vadd.xlane.f32.xlu1 %v491_v15 }
 0x13c   : > { %v490_v19 = vpop.xlane.xlu1 %489 }
 0x13d   : > { %v494_v20 = vmul.f32 0.032258064, %v490_v19 }
 0x13f   : > { %2816 = vrsqrt.f32 %v494_v20  ;;  %vm504_vm3 = vcmp.eq.f32.partialorder %v494_v20, inf  ;;  %v507_v26 = vand.u32 2147483648, %v494_v20  ;;  %vm506_vm4 = vcmp.eq.f32.partialorder %v494_v20, 0.0 }
 0x140   : > { %v493_v21 = vpop.xlane.xlu1 %492 }
 0x141   : > { %v495_v22 = vmul.f32 0.032258064, %v493_v21 }
 0x143   : > { %2818 = vrsqrt.f32 %v495_v22  ;;  %vm511_vm5 = vcmp.eq.f32.partialorder %v495_v22, inf  ;;  %v514_v33 = vand.u32 2147483648, %v495_v22  ;;  %vm513_vm6 = vcmp.eq.f32.partialorder %v495_v22, 0.0 }
 0x149   : > { %v2817_v23 = vpop.eup %2816 }
 0x14a   : > { %v503_v24 = vmul.f32 %v2817_v23, %v494_v20 }
 0x14c   : > { %v505_v27 = vsel %vm504_vm3, %v494_v20, %v503_v24 }
 0x14d   : > { %v2819_v28 = vpop.eup %2818  ;;  %v508_v29 = vsel %vm506_vm4, %v507_v26, %v505_v27 }
 0x14e   : > { %v516_v30 = vadd.f32 1e-06, %v508_v29  ;;  %v510_v31 = vmul.f32 %v2819_v28, %v495_v22 }
 0x150   : > { %2820 = vrcp.f32 %v516_v30  ;;  %v512_v34 = vsel %vm511_vm5, %v495_v22, %v510_v31 }
 0x151   : > { %v515_v35 = vsel %vm513_vm6, %v514_v33, %v512_v34 }
 0x152   : > { %v517_v36 = vadd.f32 1e-06, %v515_v35 }
 0x154   : > { %2822 = vrcp.f32 %v517_v36 }
 0x15a   : > { %v2821_v41 = vpop.eup %2820 }
 0x15b   : > { %v519_v44 = vmul.f32 %v2821_v41, %v500_v42 }
 0x15d   : > { %v526_v48 = vadd.f32 %v525_v45, %v519_v44 }
 0x15e   : > { %v2823_v46 = vpop.eup %2822 }
 0x15f   : > { %v521_v47 = vmul.f32 %v2823_v46, %v501_v43 }
 0x161   : > { %v527_v49 = vadd.f32 %v525_v45, %v521_v47 }
 0x163   : > { %v528_v50 = vpack.c.bf16 %v527_v49, %v526_v48 }
 0x165   : > { %2638 = vmatmul.mubr.msk.bf16.vlgmr.msra.gmra.mrb[0].mxu0 %vm474_vm1, %v528_v50 }
 0x166   : > { %2643 = vmatprep.mubr.msk.f32.mxu0 %vm2907_vm2, %v2906_v17 }
 0x238   : > { %v589_v52 = vpop.f32.mrb[0].mxu0 }
 0x239   : > { %v3069_v53 = vadd.f32 %v2523_v51, %v589_v52  ;;  %v2639_v54 = vpop.f32.mrb[1].mxu0 }
 0x23a   : > { %v592_v55 = vpop.f32.mrb[2].mxu0 }
 0x23b   : > { %v3071_v56 = vadd.f32 %v2523_v51, %v592_v55  ;;  %597 = vrot.lane.b32.xlu0 %v3069_v53, %s2908_s24  ;;  %v2640_v57 = vpop.f32.mrb[3].mxu0 }
 0x23d   : > { %675 = vrot.lane.b32.xlu1 %v3071_v56, %s2908_s24 }
 0x2ad   : > { %v598_v58 = vpop.permute.xlu0 %597 }
 0x2ae   : > { %2642 = vmatpush3.xpose.msk.msra.mxu0 %vm599_vm7, %v598_v58 }
 0x2af   : > { %v676_v59 = vpop.permute.xlu1 %675  ;;  %2656 = vmatprep.subr.mxu0 %v2906_v17 }
 0x2b0   : > { %2647 = vmatpush3.xpose.msk.msra.mxu1 %vm599_vm7, %v676_v59 }
 0x2b1   : > { %2644 = vmatmul.mubr.msk.f32.vlgmr.msra.gmra.mrb[4].mxu0 %vm599_vm7, %v3069_v53  ;;  %2651 = vmatprep.subr.mxu1 %v2906_v17 }
 0x2b2   : > { %2658 = vmatprep.mubr.msk.f32.mxu0 %vm2907_vm2, %v2906_v17 }
 0x2b3   : > { %2649 = vmatmul.mubr.msk.f32.vlgmr.msra.gmra.mrb[0].mxu1 %vm599_vm7, %v3071_v56 }
 0x2b4   : > { %2653 = vmatprep.mubr.msk.f32.mxu1 %vm2907_vm2, %v2906_v17 }
 0x384   : > { %v670_v9 = vpop.f32.mrb[4].mxu0 }
 0x385   : > { %v751_v10 = vmul.f32 0.35355338, %v670_v9  ;;  %v2645_v11 = vpop.f32.mrb[5].mxu0 }
 0x386   : > { %v747_v12 = vpop.f32.mrb[0].mxu1 }
 0x387   : > { %v752_v14 = vmul.f32 0.35355338, %v747_v12  ;;  %v2650_v15 = vpop.f32.mrb[1].mxu1  ;;  %v753_v16 = vsel %vm472_vm8, %v751_v10, -1e+09 }
 0x388   : > { %v755_v18 = vsel %vm599_vm7, %v753_v16, -inf }
 0x389   : > { %756 = vmax.xlane.f32.xlu1 %v755_v18  ;;  %v754_v19 = vsel %vm3099_vm9, %v752_v14, -1e+09 }
 0x38a   : > { %v758_v20 = vsel %vm599_vm7, %v754_v19, -inf }
 0x38b   : > { %759 = vmax.xlane.f32.xlu0 %v758_v20 }
 0x39a   : > { %853 = vrot.lane.b32.xlu1 %v3071_v56, %s2910_s28 }
 0x39e   : > { %933 = vrot.lane.b32.xlu1 %v3069_v53, %s2911_s29 }
 0x3a1   : > { %777 = vrot.lane.b32.xlu0 %v3069_v53, %s2910_s28 }
 0x3a2   : > { %1011 = vrot.lane.b32.xlu1 %v3071_v56, %s2911_s29 }
 0x416   : > { %v757_v21 = vpop.xlane.xlu1 %756 }
 0x417   : > { %v761_v22 = vsub.f32 %v753_v16, %v757_v21 }
 0x418   : > { %v760_v23 = vpop.xlane.xlu0 %759 }
 0x419   : > { %v763_v24 = vmul.f32 1.442695, %v761_v22  ;;  %v762_v25 = vsub.f32 %v754_v19, %v760_v23 }
 0x41a   : > { %v854_v26 = vpop.permute.xlu1 %853 }
 0x41b   : > { %2824 = vpow2.f32 %v763_v24  ;;  %v765_v27 = vmul.f32 1.442695, %v762_v25  ;;  %2657 = vmatpush3.msra.mxu0 %v854_v26  ;;  %v2539_v26 = vld [vmem:[%s2997_s19 + $0x4] sm:$0xf] }
 0x41c   : > { %v778_v28 = vpop.permute.xlu0 %777  ;;  %2666 = vmatprep.subr.mxu0 %v2906_v17 }
 0x41d   : > { %2826 = vpow2.f32 %v765_v27  ;;  %2652 = vmatpush3.msra.mxu1 %v778_v28  ;;  %v1273_v27 = vsel %vm1271_vm10, %v2539_v26, 0 }
 0x41e   : > { %2661 = vmatprep.subr.mxu1 %v2906_v17  ;;  %v934_v34 = vpop.permute.xlu1 %933 }
 0x422   : > { %v1012_v35 = vpop.permute.xlu1 %1011 }
 0x425   : > { %v2825_v29 = vpop.eup %2824 }
 0x426   : > { %v767_v30 = vsel %vm599_vm7, %v2825_v29, 0.0 }
 0x427   : > { %v2827_v31 = vpop.eup %2826  ;;  %768 = vadd.xlane.f32.xlu0 %v767_v30  ;;  %v930_v30 = vld [vmem:[%s2997_s19] sm:$0xf] }
 0x428   : > { %v770_v33 = vsel %vm599_vm7, %v2827_v31, 0.0 }
 0x429   : > { %771 = vadd.xlane.f32.xlu1 %v770_v33 }
 0x43a   : > { %1009 = vrot.lane.b32.xlu1 %v3071_v56, %s2912_s14 }
 0x43d   : > { %931 = vrot.lane.b32.xlu0 %v3069_v53, %s2912_s14 }
 0x4b4   : > { %v769_v36 = vpop.xlane.xlu0 %768 }
 0x4b5   : > { %2828 = vrcp.f32 %v769_v36  ;;  %v1320_v36 = vsel %vm1271_vm10, %v930_v30, 0 }
 0x4b6   : > { %v772_v37 = vpop.xlane.xlu1 %771 }
 0x4b7   : > { %2830 = vrcp.f32 %v772_v37 }
 0x4b8   : > { %v932_v43 = vpop.permute.xlu0 %931 }
 0x4ba   : > { %v1010_v44 = vpop.permute.xlu1 %1009 }
 0x4bf   : > { %v2829_v39 = vpop.eup %2828 }
 0x4c0   : > { %v774_v40 = vmul.f32 %v2829_v39, %v2825_v29 }
 0x4c1   : > { %v2831_v41 = vpop.eup %2830 }
 0x4c2   : > { %v776_v42 = vmul.f32 %v2831_v41, %v2827_v31  ;;  %2654 = vmatmul.mubr.msk.f32.vlgmr.msra.gmra.mrb[2].mxu1 %vm599_vm7, %v774_v40 }
 0x4c3   : > { %2662 = vmatpush3.xpose.msk.msra.mxu1 %vm599_vm7, %v934_v34  ;;  %2663 = vmatprep.mubr.msk.f32.mxu1 %vm2907_vm2, %v2906_v17 }
 0x4c4   : > { %2659 = vmatmul.mubr.msk.f32.vlgmr.msra.gmra.mrb[6].mxu0 %vm599_vm7, %v776_v42  ;;  %2671 = vmatprep.subr.mxu1 %v2906_v17 }
 0x4c5   : > { %2667 = vmatpush3.xpose.msk.msra.mxu0 %vm599_vm7, %v1012_v35  ;;  %2668 = vmatprep.mubr.msk.f32.mxu0 %vm2907_vm2, %v2906_v17 }
 0x4c6   : > { %2664 = vmatmul.mubr.msk.f32.vlgmr.msra.gmra.mrb[4].mxu1 %vm599_vm7, %v932_v43  ;;  %2676 = vmatprep.subr.mxu0 %v2906_v17 }
 0x4c7   : > { %2673 = vmatprep.mubr.msk.f32.mxu1 %vm2907_vm2, %v2906_v17 }
 0x4c8   : > { %2669 = vmatmul.mubr.msk.f32.vlgmr.msra.gmra.mrb[8].mxu0 %vm599_vm7, %v1010_v44 }
 0x4c9   : > { %2678 = vmatprep.mubr.msk.f32.mxu0 %vm2907_vm2, %v2906_v17 }
 0x595   : > { %v3135_v45 = vpop.f32.mrb[2].mxu1 }
 0x596   : > { %v2655_v46 = vpop.f32.mrb[3].mxu1 }
 0x597   : > { %v3137_v47 = vpop.f32.mrb[6].mxu0 }
 0x598   : > { %v929_v48 = vpack.c.bf16 %v3137_v47, %v3135_v45  ;;  %v2660_v49 = vpop.f32.mrb[7].mxu0 }
 0x599   : > { %v1005_v50 = vpop.f32.mrb[4].mxu1 }
 0x59a   : > { %v1087_v51 = vmul.f32 0.35355338, %v1005_v50  ;;  %v2665_v52 = vpop.f32.mrb[5].mxu1 }
 0x59b   : > { %v1083_v54 = vpop.f32.mrb[8].mxu0 }
 0x59c   : > { %v1088_v55 = vmul.f32 0.35355338, %v1083_v54  ;;  %v2670_v57 = vpop.f32.mrb[9].mxu0  ;;  %v1089_v58 = vsel %vm472_vm8, %v1087_v51, -1e+09 }
 0x59d   : > { %v1091_v59 = vsel %vm599_vm7, %v1089_v58, -inf }
 0x59e   : > { %1092 = vmax.xlane.f32.xlu0 %v1091_v59  ;;  %v1090_v60 = vsel %vm3099_vm9, %v1088_v55, -1e+09 }
 0x59f   : > { %v1094_v61 = vsel %vm599_vm7, %v1090_v60, -inf }
 0x5a0   : > { %1095 = vmax.xlane.f32.xlu1 %v1094_v61 }
 0x5b1   : > { %1189 = vrot.lane.b32.xlu1 %v3071_v56, %s2913_s17 }
 0x5b5   : > { %1443 = vrot.lane.b32.xlu1 %v3071_v56, %s2914_s18 }
 0x5b9   : > { %1441 = vrot.lane.b32.xlu1 %v3071_v56, %s2915_s20 }
 0x5bd   : > { %1363 = vrot.lane.b32.xlu1 %v3069_v53, %s2915_s20 }
 0x5c1   : > { %1751 = vrot.lane.b32.xlu1 %v3069_v53, %s2916_s12 }
 0x62b   : > { %v1093_v62 = vpop.xlane.xlu0 %1092 }
 0x62c   : > { %v1097_v63 = vsub.f32 %v1089_v58, %v1093_v62 }
 0x62d   : > { %v1096_v0 = vpop.xlane.xlu1 %1095 }
 0x62e   : > { %v1099_v1 = vmul.f32 1.442695, %v1097_v63  ;;  %v1098_v4 = vsub.f32 %v1090_v60, %v1096_v0 }
 0x630   : > { %2832 = vpow2.f32 %v1099_v1  ;;  %v1101_v6 = vmul.f32 1.442695, %v1098_v4 }
 0x631   : > { %v1190_v8 = vpop.permute.xlu1 %1189 }
 0x632   : > { %2834 = vpow2.f32 %v1101_v6  ;;  %2677 = vmatpush3.msra.mxu0 %v1190_v8 }
 0x633   : > { %2681 = vmatprep.subr.bf16.mxu0 %v2906_v17 }
 0x635   : > { %v1444_v16 = vpop.permute.xlu1 %1443 }
 0x639   : > { %v1442_v20 = vpop.permute.xlu1 %1441 }
 0x63a   : > { %v2833_v9 = vpop.eup %2832 }
 0x63b   : > { %v1103_v10 = vsel %vm599_vm7, %v2833_v9, 0.0 }
 0x63c   : > { %v2835_v11 = vpop.eup %2834  ;;  %1104 = vadd.xlane.f32.xlu0 %v1103_v10 }
 0x63d   : > { %v1106_v12 = vsel %vm599_vm7, %v2835_v11, 0.0  ;;  %v1364_v25 = vpop.permute.xlu1 %1363 }
 0x640   : > { %1107 = vadd.xlane.f32.xlu0 %v1106_v12 }
 0x641   : > { %v1752_v1 = vpop.permute.xlu1 %1751 }
 0x656   : > { %1113 = vrot.lane.b32.xlu0 %v3069_v53, %s2913_s17 }
 0x65a   : > { %1365 = vrot.lane.b32.xlu0 %v3069_v53, %s2914_s18 }
 0x6c9   : > { %v1105_v14 = vpop.xlane.xlu0 %1104 }
 0x6ca   : > { %2836 = vrcp.f32 %v1105_v14 }
 0x6cd   : > { %v1108_v15 = vpop.xlane.xlu0 %1107 }
 0x6ce   : > { %2838 = vrcp.f32 %v1108_v15 }
 0x6d1   : > { %v1114_v18 = vpop.permute.xlu0 %1113 }
 0x6d2   : > { %2672 = vmatpush3.msra.mxu1 %v1114_v18 }
 0x6d3   : > { %2693 = vmatprep.subr.mxu1 %v2906_v17 }
 0x6d4   : > { %v2837_v19 = vpop.eup %2836 }
 0x6d5   : > { %v1110_v21 = vmul.f32 %v2837_v19, %v2833_v9  ;;  %v1366_v23 = vpop.permute.xlu0 %1365 }
 0x6d7   : > { %2674 = vmatmul.mubr.msk.f32.vlgmr.msra.gmra.mrb[6].mxu1 %vm599_vm7, %v1110_v21 }
 0x6d8   : > { %v2839_v22 = vpop.eup %2838  ;;  %2695 = vmatprep.mubr.msk.f32.mxu1 %vm2907_vm2, %v2906_v17 }
 0x6d9   : > { %v1112_v24 = vmul.f32 %v2839_v22, %v2835_v11  ;;  %2694 = vmatpush3.xpose.msk.msra.mxu1 %vm599_vm7, %v1366_v23 }
 0x6da   : > { %2703 = vmatprep.subr.mxu1 %v2906_v17 }
 0x6db   : > { %2679 = vmatmul.mubr.msk.f32.vlgmr.msra.gmra.mrb[10].mxu0 %vm599_vm7, %v1112_v24 }
 0x6dc   : > { %2696 = vmatmul.mubr.msk.f32.vlgmr.msra.gmra.mrb[8].mxu1 %vm599_vm7, %v1364_v25  ;;  %2683 = vmatprep.mubr.msk.bf16.mxu0 %vm2907_vm2, %v2906_v17 }
 0x6dd   : > { %2705 = vmatprep.mubr.msk.f32.mxu1 %vm2907_vm2, %v2906_v17  ;;  %2682 = vmatpush3.bf16.msra.mxu0 %v1273_v27 }
 0x6de   : > { %2687 = vmatprep.subr.bf16.mxu0 %v2906_v17 }
 0x7aa   : > { %v1185_v28 = vpop.f32.mrb[6].mxu1 }
 0x7ab   : > { %v2675_v29 = vpop.f32.mrb[7].mxu1 }
 0x7ae   : > { %v1261_v31 = vpop.f32.mrb[10].mxu0 }
 0x7af   : > { %v1265_v33 = vpack.c.bf16 %v1261_v31, %v1185_v28  ;;  %v2680_v34 = vpop.f32.mrb[11].mxu0  ;;  %v1437_v35 = vpop.f32.mrb[8].mxu1 }
 0x7b0   : > { %v2697_v37 = vpop.f32.mrb[9].mxu1  ;;  %v1519_v62 = vmul.f32 0.35355338, %v1437_v35 }
 0x7b1   : > { %2684 = vmatmul.mubr.msk.bf16.vlgmr.msra.gmra.mrb[12].mxu0 %vm599_vm7, %v1265_v33 }
 0x7b2   : > { %2688 = vmatpush3.bf16.msra.mxu0 %v1320_v36  ;;  %2689 = vmatprep.mubr.msk.bf16.mxu0 %vm2907_vm2, %v2906_v17  ;;  %v1521_v63 = vsel %vm472_vm8, %v1519_v62, -1e+09  ;;  %v2548_v36 = vld [vmem:[%s2997_s19 + $0x8] sm:$0xf] }
 0x7b3   : > { %2698 = vmatprep.subr.mxu0 %v2906_v17  ;;  %v1523_v0 = vsel %vm599_vm7, %v1521_v63, -inf  ;;  %v1704_v37 = vsel %vm1271_vm10, %v2548_v36, 0 }
 0x7b9   : > { %2690 = vmatmul.mubr.msk.bf16.vlgmr.msra.gmra.mrb[16].mxu0 %vm599_vm7, %v929_v48 }
 0x7ba   : > { %2700 = vmatprep.mubr.msk.f32.mxu0 %vm2907_vm2, %v2906_v17 }
 0x7bb   : > { %2699 = vmatpush3.xpose.msk.msra.mxu0 %vm599_vm7, %v1444_v16 }
 0x7bc   : > { %2708 = vmatprep.subr.mxu0 %v2906_v17 }
 0x7c1   : > { %2701 = vmatmul.mubr.msk.f32.vlgmr.msra.gmra.mrb[20].mxu0 %vm599_vm7, %v1442_v20 }
 0x7c2   : > { %2710 = vmatprep.mubr.msk.f32.mxu0 %vm2907_vm2, %v2906_v17 }
 0x884   : > { %v1309_v39 = vpop.f32.mrb[12].mxu0 }
 0x885   : > { %v2685_v40 = vpop.f32.mrb[13].mxu0 }
 0x886   : > { %v1312_v41 = vpop.f32.mrb[14].mxu0 }
 0x887   : > { %v2686_v42 = vpop.f32.mrb[15].mxu0 }
 0x88c   : > { %v1356_v43 = vpop.f32.mrb[16].mxu0 }
 0x88d   : > { %v3190_v44 = vadd.f32 %v1356_v43, %v1309_v39  ;;  %v2691_v45 = vpop.f32.mrb[17].mxu0 }
 0x88e   : > { %v1359_v46 = vpop.f32.mrb[18].mxu0 }
 0x88f   : > { %v3192_v47 = vadd.f32 %v1359_v46, %v1312_v41  ;;  %v2692_v48 = vpop.f32.mrb[19].mxu0 }
 0x894   : > { %v1515_v49 = vpop.f32.mrb[20].mxu0 }
 0x895   : > { %v1520_v50 = vmul.f32 0.35355338, %v1515_v49  ;;  %v2702_v51 = vpop.f32.mrb[21].mxu0 }
 0x897   : > { %v1522_v52 = vsel %vm3099_vm9, %v1520_v50, -1e+09 }
 0x898   : > { %v1526_v54 = vsel %vm599_vm7, %v1522_v52, -inf }
 0x899   : > { %1527 = vmax.xlane.f32.xlu0 %v1526_v54 }
 0x8af   : > { %1621 = vrot.lane.b32.xlu0 %v3071_v56, %s2917_s13 }
 0x8b3   : > { %1749 = vrot.lane.b32.xlu0 %v3069_v53, %s2918_s21 }
 0x8b7   : > { %1827 = vrot.lane.b32.xlu0 %v3071_v56, %s2918_s21 }
 0x926   : > { %v1528_v55 = vpop.xlane.xlu0 %1527 }
 0x927   : > { %v1530_v57 = vsub.f32 %v1522_v52, %v1528_v55 }
 0x929   : > { %v1533_v58 = vmul.f32 1.442695, %v1530_v57 }
 0x92a   : > { %v1622_v59 = vpop.permute.xlu0 %1621 }
 0x92b   : > { %2840 = vpow2.f32 %v1533_v58  ;;  %2709 = vmatpush3.msra.mxu0 %v1622_v59 }
 0x92c   : > { %2719 = vmatprep.subr.mxu0 %v2906_v17 }
 0x92e   : > { %v1750_v9 = vpop.permute.xlu0 %1749 }
 0x932   : > { %v1828_v11 = vpop.permute.xlu0 %1827 }
 0x935   : > { %v2841_v60 = vpop.eup %2840 }
 0x936   : > { %v1538_v61 = vsel %vm599_vm7, %v2841_v60, 0.0 }
 0x937   : > { %1539 = vadd.xlane.f32.xlu1 %v1538_v61 }
 0x948   : > { %1829 = vrot.lane.b32.xlu1 %v3071_v56, %s2916_s12 }
 0x96c   : > { %1524 = vmax.xlane.f32.xlu1 %v1523_v0 }
 0x9c4   : > { %v1540_v4 = vpop.xlane.xlu1 %1539 }
 0x9c5   : > { %2842 = vrcp.f32 %v1540_v4 }
 0x9c8   : > { %v1830_v10 = vpop.permute.xlu1 %1829 }
 0x9cf   : > { %v2843_v6 = vpop.eup %2842 }
 0x9d0   : > { %v1544_v8 = vmul.f32 %v2843_v6, %v2841_v60  ;;  %v2556_v60 = vld [vmem:[%s2997_s19 + $0xc] sm:$0xf] }
 0x9d1   : > { %v2090_v61 = vsel %vm1271_vm10, %v2556_v60, 0 }
 0x9d2   : > { %2711 = vmatmul.mubr.msk.f32.vlgmr.msra.gmra.mrb[22].mxu0 %vm599_vm7, %v1544_v8 }
 0x9d3   : > { %2720 = vmatpush3.xpose.msk.msra.mxu0 %vm599_vm7, %v1752_v1  ;;  %2721 = vmatprep.mubr.msk.f32.mxu0 %vm2907_vm2, %v2906_v17 }
 0x9d4   : > { %2724 = vmatprep.subr.mxu0 %v2906_v17 }
 0x9d6   : > { %2722 = vmatmul.mubr.msk.f32.vlgmr.msra.gmra.mrb[24].mxu0 %vm599_vm7, %v1750_v9 }
 0x9d7   : > { %2725 = vmatpush3.xpose.msk.msra.mxu0 %vm599_vm7, %v1830_v10  ;;  %2726 = vmatprep.mubr.msk.f32.mxu0 %vm2907_vm2, %v2906_v17 }
 0x9d8   : > { %2734 = vmatprep.subr.mxu0 %v2906_v17 }
 0x9da   : > { %2727 = vmatmul.mubr.msk.f32.vlgmr.msra.gmra.mrb[26].mxu0 %vm599_vm7, %v1828_v11 }
 0x9db   : > { %2736 = vmatprep.mubr.msk.f32.mxu0 %vm2907_vm2, %v2906_v17 }
 0x9f9   : > { %v1525_v12 = vpop.xlane.xlu1 %1524 }
 0x9fa   : > { %v1529_v14 = vsub.f32 %v1521_v63, %v1525_v12 }
 0x9fc   : > { %v1531_v15 = vmul.f32 1.442695, %v1529_v14 }
 0x9fe   : > { %2844 = vpow2.f32 %v1531_v15 }
 0xa08   : > { %v2845_v16 = vpop.eup %2844 }
 0xa09   : > { %v1535_v18 = vsel %vm599_vm7, %v2845_v16, 0.0 }
 0xa0a   : > { %1536 = vadd.xlane.f32.xlu0 %v1535_v18 }
 0xa20   : > { %1545 = vrot.lane.b32.xlu0 %v3069_v53, %s2917_s13 }
 0xa24   : > { %2007 = vrot.lane.b32.xlu0 %v3071_v56, %s2919_s23 }
 0xa97   : > { %v1537_v19 = vpop.xlane.xlu0 %1536 }
 0xa98   : > { %2846 = vrcp.f32 %v1537_v19 }
 0xa9b   : > { %v1546_v20 = vpop.permute.xlu0 %1545 }
 0xa9c   : > { %2704 = vmatpush3.msra.mxu1 %v1546_v20 }
 0xa9d   : > { %2713 = vmatprep.subr.bf16.mxu1 %v2906_v17 }
 0xa9f   : > { %v2008_v21 = vpop.permute.xlu0 %2007 }
 0xaa0   : > { %2735 = vmatpush3.msra.mxu0 %v2008_v21 }
 0xaa1   : > { %2745 = vmatprep.subr.bf16.mxu0 %v2906_v17 }
 0xaa2   : > { %v2847_v22 = vpop.eup %2846 }
 0xaa3   : > { %v1542_v23 = vmul.f32 %v2847_v22, %v2845_v16 }
 0xaa5   : > { %2706 = vmatmul.mubr.msk.f32.vlgmr.msra.gmra.mrb[10].mxu1 %vm599_vm7, %v1542_v23  ;;  %v1693_v24 = vpop.f32.mrb[22].mxu0 }
 0xaa6   : > { %v2712_v25 = vpop.f32.mrb[23].mxu0  ;;  %2715 = vmatprep.mubr.msk.bf16.mxu1 %vm2907_vm2, %v2906_v17  ;;  %2714 = vmatpush3.bf16.msra.mxu1 %v1704_v37 }
 0xaa7   : > { %2729 = vmatprep.subr.mxu1 %v2906_v17 }
 0xaa9   : > { %v1823_v56 = vpop.f32.mrb[24].mxu0 }
 0xaaa   : > { %v1905_v26 = vmul.f32 0.35355338, %v1823_v56  ;;  %v2723_v27 = vpop.f32.mrb[25].mxu0 }
 0xaac   : > { %v1907_v28 = vsel %vm472_vm8, %v1905_v26, -1e+09 }
 0xaad   : > { %v1901_v29 = vpop.f32.mrb[26].mxu0  ;;  %v1909_v30 = vsel %vm599_vm7, %v1907_v28, -inf }
 0xaae   : > { %v1906_v31 = vmul.f32 0.35355338, %v1901_v29  ;;  %1910 = vmax.xlane.f32.xlu1 %v1909_v30  ;;  %v2728_v33 = vpop.f32.mrb[27].mxu0 }
 0xaaf   : > { %v2806_v33 = vld [vmem:[%s3002_s22] sm:$0xff]  }
 0xab0   : > { %v1908_v34 = vsel %vm3099_vm9, %v1906_v31, -1e+09 }
 0xab1   : > { %v1912_v35 = vsel %vm599_vm7, %v1908_v34, -inf }
 0xab2   : > { %1913 = vmax.xlane.f32.xlu1 %v1912_v35 }
 0xb3b   : > { %v1911_v7 = vpop.xlane.xlu1 %1910 }
 0xb3c   : > { %v1915_v39 = vsub.f32 %v1907_v28, %v1911_v7 }
 0xb3e   : > { %v1917_v40 = vmul.f32 1.442695, %v1915_v39 }
 0xb3f   : > { %v1914_v41 = vpop.xlane.xlu1 %1913 }
 0xb40   : > { %2848 = vpow2.f32 %v1917_v40  ;;  %v1916_v42 = vsub.f32 %v1908_v34, %v1914_v41  ;;  %v2807_v34 = vld [vmem:[%s3002_s22 + $0x8] sm:$0xff]  }
 0xb42   : > { %v1919_v43 = vmul.f32 1.442695, %v1916_v42 }
 0xb44   : > { %2850 = vpow2.f32 %v1919_v43 }
 0xb4a   : > { %v2849_v45 = vpop.eup %2848 }
 0xb4b   : > { %v1921_v13 = vsel %vm599_vm7, %v2849_v45, 0.0 }
 0xb4c   : > { %1922 = vadd.xlane.f32.xlu1 %v1921_v13 }
 0xb4e   : > { %v2851_v46 = vpop.eup %2850 }
 0xb4f   : > { %v1924_v48 = vsel %vm599_vm7, %v2851_v46, 0.0 }
 0xb50   : > { %1925 = vadd.xlane.f32.xlu1 %v1924_v48 }
 0xb61   : > { %1931 = vrot.lane.b32.xlu1 %v3069_v53, %s2919_s23 }
 0xb78   : > { %v1617_v49 = vpop.f32.mrb[10].mxu1 }
 0xb79   : > { %v1697_v50 = vpack.c.bf16 %v1693_v24, %v1617_v49  ;;  %v2707_v51 = vpop.f32.mrb[11].mxu1 }
 0xb7b   : > { %2716 = vmatmul.mubr.msk.bf16.vlgmr.msra.gmra.mrb[12].mxu1 %vm599_vm7, %v1697_v50 }
 0xb7c   : > { %2731 = vmatprep.mubr.msk.f32.mxu1 %vm2907_vm2, %v2906_v17 }
 0xbd9   : > { %v1923_v52 = vpop.xlane.xlu1 %1922 }
 0xbda   : > { %2852 = vrcp.f32 %v1923_v52  ;;  %v2165_v52 = vsub.s32 3, %v3052_v32 }
 0xbdd   : > { %v1926_v54 = vpop.xlane.xlu1 %1925 }
 0xbde   : > { %2854 = vrcp.f32 %v1926_v54  ;;  %v2166_v54 = vrot.slane %v3056_v38, %v2165_v52 }
 0xbe1   : > { %v1932_v55 = vpop.permute.xlu1 %1931 }
 0xbe2   : > { %2730 = vmatpush3.msra.mxu1 %v1932_v55  ;;  %v2191_v55 = vsub.s32 4, %v3052_v32 }
 0xbe3   : > { %2739 = vmatprep.subr.bf16.mxu1 %v2906_v17 }
 0xbe4   : > { %v2853_v57 = vpop.eup %2852  ;;  %v2192_v60 = vrot.slane %v3056_v38, %v2191_v55 }
 0xbe5   : > { %v1928_v58 = vmul.f32 %v2853_v57, %v2849_v45 }
 0xbe7   : > { %2732 = vmatmul.mubr.msk.f32.vlgmr.msra.gmra.mrb[16].mxu1 %vm599_vm7, %v1928_v58 }
 0xbe8   : > { %v2855_v53 = vpop.eup %2854  ;;  %2741 = vmatprep.mubr.msk.bf16.mxu1 %vm2907_vm2, %v2906_v17  ;;  %2740 = vmatpush3.bf16.msra.mxu1 %v2090_v61 }
 0xbe9   : > { %v1930_v59 = vmul.f32 %v2855_v53, %v2851_v46  ;;  %2753 = vmatprep.subr.bf16.mxu1 %v2906_v17 }
 0xbeb   : > { %2737 = vmatmul.mubr.msk.f32.vlgmr.msra.gmra.mrb[28].mxu0 %vm599_vm7, %v1930_v59 }
 0xbec   : > { %2749 = vmatprep.mubr.msk.bf16.mxu0 %vm2907_vm2, %v2906_v17  ;;  %2746 = vmatpush3.bf16.msra.mxu0 %v2806_v33 }
 0xbed   : > { %2747 = vmatprep.subr.bf16.mxu0 %v2906_v17 }
 0xbf0   : > { %2748 = vmatpush3.bf16.msra.mxu0 %v2807_v34 }
 0xc4e   : > { %v1740_v62 = vpop.f32.mrb[12].mxu1 }
 0xc4f   : > { %v1747_v63 = vadd.f32 %v1740_v62, %v3190_v44  ;;  %v2717_v0 = vpop.f32.mrb[13].mxu1  ;;  %v2140_v44 = vrot.slane %v3056_v38, %v3092_v5 }
 0xc50   : > { %v1743_v1 = vpop.f32.mrb[14].mxu1 }
 0xc51   : > { %v1748_v4 = vadd.f32 %v1743_v1, %v3192_v47  ;;  %v2718_v6 = vpop.f32.mrb[15].mxu1 }
 0xc52   : > { %v2809_v6 = vld [vmem:[%s3007_s25 + $0x8] sm:$0xff]  }
 0xcba   : > { %v2003_v8 = vpop.f32.mrb[16].mxu1 }
 0xcbb   : > { %v2733_v9 = vpop.f32.mrb[17].mxu1 }
 0xcbc   : > { %v2811_v9 = vld [vmem:[%s3007_s25 + $0x18] sm:$0xff]  }
 0xcbe   : > { %v2079_v10 = vpop.f32.mrb[28].mxu0 }
 0xcbf   : > { %v2083_v11 = vpack.c.bf16 %v2079_v10, %v2003_v8  ;;  %v2738_v12 = vpop.f32.mrb[29].mxu0  ;;  %v2810_v8 = vld [vmem:[%s3007_s25 + $0x10] sm:$0xff]   ;;  %v2812_v10 = vld [vmem:[%s3007_s25 + $0x20] sm:$0xff]  }
 0xcc0   : > { %v2814_v12 = vld [vmem:[%s3007_s25 + $0x30] sm:$0xff]  }
 0xcc1   : > { %2742 = vmatmul.mubr.msk.bf16.vlgmr.msra.gmra.mrb[20].mxu1 %vm599_vm7, %v2083_v11  ;;  %v2813_v11 = vld [vmem:[%s3007_s25 + $0x28] sm:$0xff]  }
 0xcc2   : > { %2769 = vmatprep.mubr.msk.bf16.mxu1 %vm2907_vm2, %v2906_v17 }
 0xd94   : > { %v2126_v14 = vpop.f32.mrb[20].mxu1 }
 0xd95   : > { %v2133_v15 = vadd.f32 %v2126_v14, %v1747_v63  ;;  %v2743_v16 = vpop.f32.mrb[21].mxu1  ;;  %v2815_v14 = vld [vmem:[%s3007_s25 + $0x38] sm:$0xff]  }
 0xd96   : > { %v2129_v18 = vpop.f32.mrb[22].mxu1 }
 0xd97   : > { %v2135_v47 = vadd.f32 %v2133_v15, %v3030_v2  ;;  %v2134_v19 = vadd.f32 %v2129_v18, %v1748_v4  ;;  %v2744_v20 = vpop.f32.mrb[23].mxu1  ;;  %v2808_v4 = vld [vmem:[%s3007_s25] sm:$0xff]   ;;  %s2400_s25 = sshll.u32 %s2920_s11, 4  ;;  %s2401_s25 = int_to_ptr.vmem [resolvable:$true] %s2400_s25 }
 0xd98   : > { %2754 = vmatpush3.bf16.msra.mxu1 %v2808_v4  ;;  %v2558_v15 = vld [vmem:[%s419_s15] ss:$0 sm:$0xff]  ;;  %s2868_s15 = scalar_lea.vmem %s2401_s25, 256  ;;  %p2875_p9 = scmp.lt.s32.totalorder %s2401_s25, %s2401_s25 }
 0xd99   : > { %v3265_v21 = vadd.f32 %v2140_v44, %v2135_v47  ;;  %v2136_v22 = vadd.f32 %v2134_v19, %v3032_v3  ;;  %2755 = vmatprep.subr.bf16.mxu1 %v2906_v17  ;;  %p2869_p6 = scmp.ne.s32.totalorder %s2401_s25, %s2868_s15  ;;  %p2876_p10 = scmp.lt.s32.totalorder %s2868_s15, %s2868_s15 }
 0xd9b   : > { %v3268_v23 = vadd.f32 %v2140_v44, %v2136_v22  ;;  %v2143_v24 = vsel %vm474_vm1, %v3265_v21, 0.0  ;;  %p2870_p7 = pnand %p2869_p6, %p2777_p5  ;;  %p2877_p11 = por %p2876_p10, %p2875_p9 }
 0xd9c   : > { %2144 = vadd.xlane.f32.xlu0 %v2143_v24  ;;  %2756 = vmatpush3.bf16.msra.mxu1 %v2809_v6 }
 0xd9d   : > { %v2146_v5 = vsel %vm474_vm1, %v3268_v23, 0.0  ;;  %2757 = vmatprep.subr.bf16.mxu1 %v2906_v17  ;;  %p2871_p8 = pneg %p2870_p7 }
 0xd9e   : > { %2147 = vadd.xlane.f32.xlu1 %v2146_v5 }
 0xd9f   : > { %p2878_p12 = pnand %p2877_p11, %p2871_p8 }
 0xda0   : > { %2758 = vmatpush3.bf16.msra.mxu1 %v2810_v8 }
 0xda1   : > { %2759 = vmatprep.subr.bf16.mxu1 %v2906_v17 }
 0xda4   : > { %2760 = vmatpush3.bf16.msra.mxu1 %v2811_v9 }
 0xda5   : > { %2761 = vmatprep.subr.bf16.mxu1 %v2906_v17 }
 0xda8   : > { %2762 = vmatpush3.bf16.msra.mxu1 %v2812_v10 }
 0xda9   : > { %2763 = vmatprep.subr.bf16.mxu1 %v2906_v17 }
 0xdac   : > { %2764 = vmatpush3.bf16.msra.mxu1 %v2813_v11 }
 0xdad   : > { %2765 = vmatprep.subr.bf16.mxu1 %v2906_v17 }
 0xdb0   : > { %2766 = vmatpush3.bf16.msra.mxu1 %v2814_v12 }
 0xdb1   : > { %2767 = vmatprep.subr.bf16.mxu1 %v2906_v17 }
 0xdb4   : > { %2768 = vmatpush3.bf16.msra.mxu1 %v2815_v14 }
 0xe29   : > { %v2145_v25 = vpop.xlane.xlu0 %2144 }
 0xe2a   : > { %v2149_v2 = vmul.f32 0.03125, %v2145_v25 }
 0xe2b   : > { %v2148_v56 = vpop.xlane.xlu1 %2147 }
 0xe2c   : > { %v2151_v26 = vsub.f32 %v3265_v21, %v2149_v2  ;;  %v2150_v27 = vmul.f32 0.03125, %v2148_v56 }
 0xe2e   : > { %v2152_v3 = vsub.f32 %v3268_v23, %v2150_v27  ;;  %v2153_v28 = vmul.f32 %v2151_v26, %v2151_v26  ;;  %v2167_v58 = vmul.f32 %v2166_v54, %v2151_v26 }
 0xe30   : > { %v2155_v29 = vsel %vm474_vm1, %v2153_v28, 0.0  ;;  %v2154_v30 = vmul.f32 %v2152_v3, %v2152_v3  ;;  %v2168_v53 = vmul.f32 %v2166_v54, %v2152_v3 }
 0xe31   : > { %2156 = vadd.xlane.f32.xlu0 %v2155_v29 }
 0xe32   : > { %v2158_v31 = vsel %vm474_vm1, %v2154_v30, 0.0 }
 0xe35   : > { %2159 = vadd.xlane.f32.xlu0 %v2158_v31 }
 0xebe   : > { %v2157_v35 = vpop.xlane.xlu0 %2156 }
 0xebf   : > { %v2161_v36 = vmul.f32 0.032258064, %v2157_v35 }
 0xec1   : > { %2856 = vrsqrt.f32 %v2161_v36  ;;  %vm2171_vm11 = vcmp.eq.f32.partialorder %v2161_v36, inf  ;;  %v2174_v41 = vand.u32 2147483648, %v2161_v36  ;;  %vm2173_vm12 = vcmp.eq.f32.partialorder %v2161_v36, 0.0 }
 0xec2   : > { %v2160_v37 = vpop.xlane.xlu0 %2159 }
 0xec3   : > { %v2162_v7 = vmul.f32 0.032258064, %v2160_v37 }
 0xec5   : > { %2858 = vrsqrt.f32 %v2162_v7  ;;  %vm2178_vm13 = vcmp.eq.f32.partialorder %v2162_v7, inf  ;;  %v2181_v48 = vand.u32 2147483648, %v2162_v7  ;;  %vm2180_vm14 = vcmp.eq.f32.partialorder %v2162_v7, 0.0 }
 0xecb   : > { %v2857_v39 = vpop.eup %2856 }
 0xecc   : > { %v2170_v40 = vmul.f32 %v2857_v39, %v2161_v36 }
 0xece   : > { %v2172_v42 = vsel %vm2171_vm11, %v2161_v36, %v2170_v40 }
 0xecf   : > { %v2859_v43 = vpop.eup %2858  ;;  %v2175_v45 = vsel %vm2173_vm12, %v2174_v41, %v2172_v42 }
 0xed0   : > { %v2183_v13 = vadd.f32 1e-06, %v2175_v45  ;;  %v2177_v46 = vmul.f32 %v2859_v43, %v2162_v7 }
 0xed2   : > { %2860 = vrcp.f32 %v2183_v13  ;;  %v2179_v49 = vsel %vm2178_vm13, %v2162_v7, %v2177_v46  ;;  %v2299_v7 = vsub.s32 5, %v3052_v32 }
 0xed3   : > { %v2182_v50 = vsel %vm2180_vm14, %v2181_v48, %v2179_v49 }
 0xed4   : > { %v2184_v51 = vadd.f32 1e-06, %v2182_v50  ;;  %v2300_v39 = vrot.slane %v3056_v38, %v2299_v7 }
 0xed6   : > { %2862 = vrcp.f32 %v2184_v51 }
 0xedc   : > { %v2861_v57 = vpop.eup %2860 }
 0xedd   : > { %v2186_v59 = vmul.f32 %v2861_v57, %v2167_v58 }
 0xedf   : > { %v2193_v63 = vadd.f32 %v2192_v60, %v2186_v59 }
 0xee0   : > { %v2863_v61 = vpop.eup %2862 }
 0xee1   : > { %v2188_v62 = vmul.f32 %v2863_v61, %v2168_v53 }
 0xee3   : > { %v2194_v0 = vadd.f32 %v2192_v60, %v2188_v62 }
 0xee5   : > { %v2195_v1 = vpack.c.bf16 %v2194_v0, %v2193_v63 }
 0xee7   : > { %2750 = vmatmul.mubr.msk.bf16.vlgmr.msra.gmra.mrb[32].mxu0 %vm474_vm1, %v2195_v1 }
 0xfba   : > { %v2255_v44 = vpop.f32.mrb[32].mxu0 }
 0xfbb   : > { %v2256_v16 = vadd.f32 %v2558_v15, %v2255_v44  ;;  %v2751_v18 = vpop.f32.mrb[33].mxu0 }
 0xfbc   : > { %v2258_v47 = vpop.f32.mrb[34].mxu0 }
 0xfbd   : > { %v2264_v19 = vmul.f32 %v2256_v16, %v2256_v16  ;;  %v2259_v20 = vadd.f32 %v2558_v15, %v2258_v47  ;;  %v2752_v22 = vpop.f32.mrb[35].mxu0  ;;  %v2262_v31 = vmul.f32 0.5, %v2256_v16 }
 0xfbf   : > { %v2266_v24 = vmul.f32 %v2264_v19, %v2256_v16  ;;  %v2265_v5 = vmul.f32 %v2259_v20, %v2259_v20  ;;  %v2263_v33 = vmul.f32 0.5, %v2259_v20 }
 0xfc1   : > { %v2268_v25 = vmul.f32 0.044715, %v2266_v24  ;;  %v2267_v2 = vmul.f32 %v2265_v5, %v2259_v20 }
 0xfc3   : > { %v2270_v56 = vadd.f32 %v2268_v25, %v2256_v16  ;;  %v2269_v26 = vmul.f32 0.044715, %v2267_v2 }
 0xfc5   : > { %v2272_v17 = vmul.f32 0.7978846, %v2270_v56  ;;  %v2271_v27 = vadd.f32 %v2269_v26, %v2259_v20 }
 0xfc7   : > { %2864 = vtanh.f32 %v2272_v17  ;;  %v2273_v3 = vmul.f32 0.7978846, %v2271_v27 }
 0xfc9   : > { %2866 = vtanh.f32 %v2273_v3 }
 0xfd1   : > { %v2865_v28 = vpop.eup %2864 }
 0xfd2   : > { %v2276_v29 = vadd.f32 1.0, %v2865_v28 }
 0xfd3   : > { %v2867_v30 = vpop.eup %2866 }
 0xfd4   : > { %v2277_v34 = vadd.f32 1.0, %v2867_v30  ;;  %v2278_v35 = vmul.f32 %v2276_v29, %v2262_v31 }
 0xfd6   : > { %v2279_v36 = vmul.f32 %v2277_v34, %v2263_v33 }
 0xfd8   : > { %v2280_v37 = vpack.c.bf16 %v2279_v36, %v2278_v35 }
 0xfda   : > { %2770 = vmatmul.mubr.bf16.vlgmr.msra.gmra.mrb[24].mxu1 %v2280_v37 }
0x10ad   : > { %v2383_v40 = vpop.f32.mrb[24].mxu1 }
0x10ae   : > { %v2384_v41 = vadd.f32 %v2383_v40, %v2300_v39  ;;  %v2771_v42 = vpop.f32.mrb[25].mxu1 }
0x10af   : > { %v2386_v43 = vpop.f32.mrb[26].mxu1 }
0x10b0   : > { %v2390_v45 = vadd.f32 %v2384_v41, %v3265_v21  ;;  %v2387_v13 = vadd.f32 %v2386_v43, %v2300_v39  ;;  %v2772_v46 = vpop.f32.mrb[27].mxu1 }
0x10b2   : > { %2392 = vst.msk [vmem:[#allocation2] sm:$0xff] %vm474_vm1, %v2390_v45  ;;  %v2391_v48 = vadd.f32 %v2387_v13, %v3268_v23 }
0x10b4   : > { %2393 = vst.msk [vmem:[#allocation2 + $0x8] sm:$0xff] %vm474_vm1, %v2391_v48 }
0x10b5   : > { %2881 = shalt.err (!%p2878_p12)
}
0x10b6   : > { %s2882_s24 = scalar_lea.hbm %s3347_s9, 256 }
0x10b7   : > { %p2883_p13 = scmp.ne.s32.totalorder %s3347_s9, %s2882_s24  ;;  %p2888_p2 = scmp.lt.u32.totalorder %s2882_s24, %s3347_s9 }
0x10b9   : > { %p2884_p0 = pnand %p2883_p13, %p2777_p5 }
0x10bb   : > { %p2885_p1 = pneg %p2884_p0 }
0x10bd   : > { %p2890_p3 = pnand %p2888_p2, %p2885_p1 }
0x10bf   : > { %2893 = shalt.err (!%p2890_p3)
}
0x10c0   : > { %s2921_s14 = smov 128   ;;  %s2922_s17 = smov 8  }
0x10c1   : > { %2774 = dma.vmem_to_hbm [thread:$0]  (%p2777_p5), %s2401_s25, 256, %s3347_s9, [#allocation3], %s2921_s14, %s2921_s14, %s2922_s17  }
0x10c2   : > { %2899 = dma.done.wait (%p2777_p5), [#allocation3], 256  }
0x10c3   : > { %2901 = vsyncadd (%p2777_p5), [#allocation3], 4294967040 }
0x10c4 PF: > { %s20_s30 = sadd.s32 1, %s2904_s30  }
0x10c5   : > { %p17_p4 = scmp.ge.s32.totalorder %s20_s30, 4  }
0x10c7   :  { %19 = sbr.rel (!%p17_p4) target bundleno = 3 (0x3), region = 108 }
0x10ce   :  { %2416 = vsyncpa [#allocation3], 1 }
0x10cf   :  { %2418 = vsyncpa [#allocation3 + $0x1], 1 }

</bundles_post_ra>
